<compile_context>
chip_gen: v6e
topology: v6e:2x2x1
jax: 0.10.0
libtpu: 0.0.40
codegen_flags: <defaults>
</compile_context>

<pallas_src>
import numpy as np
import jax
import jax.numpy as jnp
from jax.experimental import pallas as pl
from jax.experimental.pallas import tpu as pltpu


def _round_up(x, m):
    return ((x + m - 1) // m) * m


def _cdiv(a, b):
    return (a + b - 1) // b


# --------------------------- fused encoder + KL + mask kernel ---------------------------
def _make_fused_kernel(*, K, TB, C_pad, M_pad, E_pad, H_pad, D_pad, D_true):
    inv_k = 1.0 / float(K)
    d = float(D_true)          # KL dimensionality = TRUE embedding dim (padded cols are 0)
    V_COL = D_true             # lane column of uw_packed / head_bias carrying the log-sigma head

    def kernel(centers_ref, ctx_ref, keep_ref,
               fwc_ref, fwx_ref, fb_ref, uwp_ref, hb_ref,
               lf_mu_ref, lf_sig_ref, out_mask_ref,
               score_ref):
        # ---------- BSG context encoder: K center sets share one context matmul ----------
        hx = jnp.dot(ctx_ref[...], fwx_ref[...],
                     preferred_element_type=jnp.float32).reshape(TB, C_pad, H_pad)
        hc = jnp.dot(centers_ref[...].reshape(K * TB, E_pad), fwc_ref[...],
                     preferred_element_type=jnp.float32).reshape(K, TB, H_pad)
        hcb = hc + fb_ref[...]                       # fold f-bias once (not per-k)
        keep3 = keep_ref[...][:, :, None]            # hoisted broadcast (no per-k re-emit)

        h_sums = []
        for k in range(K):                           # static unroll, K <= 3
            h = jnp.maximum(hx + hcb[k][:, None, :], 0.0)         # (TB, C_pad, H_pad)
            h_sums.append(jnp.sum(h * keep3, axis=1))             # keep-MASKED context sum
        h_all = jnp.concatenate(h_sums, axis=0).astype(jnp.bfloat16)   # (K*TB, H_pad)

        # One batched head matmul; vw rides in column V_COL of uw_packed, vb in head bias.
        head = jnp.dot(h_all, uwp_ref[...],
                       preferred_element_type=jnp.float32) + hb_ref[...]   # (K*TB, D_pad)
        head = head.reshape(K, TB, D_pad)
        lane = jax.lax.broadcasted_iota(jnp.int32, (1, 1, D_pad), 2)
        is_v = lane == V_COL
        sf_mu = jnp.sum(jnp.where(is_v, 0.0, head), axis=0) * inv_k        # (TB, D_pad)
        log_sig = jnp.sum(jnp.where(is_v, head, 0.0), axis=-1, keepdims=True)   # (K, TB, 1)
        sf_sigma = jnp.sum(jnp.exp(log_sig), axis=0) * inv_k               # mean of sigmas

        # ---------- KL(q(z|SF,ctx) || p(z|LF_k)) on pre-reduced LF priors + mask fill ----------
        lf_mu = lf_mu_ref[...]                        # (TB, M_pad, D_pad), padded cols 0
        lf_sig = jnp.maximum(lf_sig_ref[...], 1e-8)   # guard padded rows (always masked anyway)
        diff = sf_mu[:, None, :] - lf_mu
        sq = jnp.sum(diff * diff, axis=-1)            # (TB, M_pad)
        kl = (d * (jnp.log(lf_sig) - jnp.log(sf_sigma))
              + (sq + d * sf_sigma * sf_sigma) / (2.0 * lf_sig * lf_sig)
              - 0.5 * d)
        score_ref[...] = jnp.where(out_mask_ref[...] > 0.0, -jnp.inf, -kl)

    return kernel


# ----------------------------------- Parameter initialization -----------------------------------
def init_params(key, vocab_size, embed_dim, enc_input_dim, enc_hidden_dim):
    E_pad = _round_up(enc_input_dim, 128)
    H_pad = _round_up(enc_hidden_dim, 128)
    D_pad = _round_up(embed_dim + 1, 128)    # +1 reserves a zero lane column for the packed v-head
    ks = jax.random.split(key, 8)

    # Gaussian prior tables kept UNPADDED (gather + L-reduce happen at true D in the wrapper).
    emb_mu = jax.random.normal(ks[0], (vocab_size, embed_dim), jnp.float32)
    emb_mu = emb_mu.at[0].set(0.0)                                       # padding_idx = 0
    emb_log_sigma = jax.random.uniform(ks[1], (vocab_size, 1), jnp.float32, -3.5, -1.5)
    emb_log_sigma = emb_log_sigma.at[0].set(0.0)                         # padding_idx = 0

    # Encoder embedding table: padded to E_pad and stored bf16 (bf16 DMA into the kernel).
    enc_emb = jax.random.normal(ks[2], (vocab_size, enc_input_dim), jnp.float32)
    enc_emb = enc_emb.at[0].set(0.0)                                     # padding_idx = 0
    enc_emb = jnp.pad(enc_emb, ((0, 0), (0, E_pad - enc_input_dim))).astype(jnp.bfloat16)

    fw_center = 0.1 * jax.random.normal(ks[3], (enc_input_dim, enc_hidden_dim), jnp.float32)
    fw_context = 0.1 * jax.random.normal(ks[4], (enc_input_dim, enc_hidden_dim), jnp.float32)
    fw_center = jnp.pad(fw_center, ((0, E_pad - enc_input_dim),
                                    (0, H_pad - enc_hidden_dim))).astype(jnp.bfloat16)
    fw_context = jnp.pad(fw_context, ((0, E_pad - enc_input_dim),
                                      (0, H_pad - enc_hidden_dim))).astype(jnp.bfloat16)

    fb = 0.01 * jax.random.normal(ks[7], (1, enc_hidden_dim), jnp.float32)
    fb = jnp.pad(fb, ((0, 0), (0, H_pad - enc_hidden_dim)))              # padded H cols stay 0

    uw = 0.1 * jax.random.normal(ks[5], (enc_hidden_dim, embed_dim), jnp.float32)
    ub = jnp.zeros((1, embed_dim), jnp.float32)
    vw = 0.02 * jax.random.normal(ks[6], (1, enc_hidden_dim), jnp.float32)
    vb = jnp.zeros((1, 1), jnp.float32)

    # Pack mu-head and log-sigma-head into one weight (v-head in column index embed_dim).
    uw_packed = jnp.zeros((enc_hidden_dim, D_pad), jnp.float32)
    uw_packed = uw_packed.at[:, :embed_dim].set(uw)
    uw_packed = uw_packed.at[:, embed_dim].set(vw[0])
    uw_packed = jnp.pad(uw_packed, ((0, H_pad - enc_hidden_dim), (0, 0))).astype(jnp.bfloat16)

    head_bias = jnp.zeros((1, D_pad), jnp.float32)
    head_bias = head_bias.at[:, :embed_dim].set(ub)
    head_bias = head_bias.at[0, embed_dim].set(vb[0, 0])

    return dict(embeddings_mu=emb_mu, embeddings_log_sigma=emb_log_sigma,
                enc_embeddings=enc_emb, fw_center=fw_center, fw_context=fw_context,
                fb=fb, uw_packed=uw_packed, head_bias=head_bias,
                dims=dict(E=enc_input_dim, H=enc_hidden_dim, D=embed_dim,
                          E_pad=E_pad, H_pad=H_pad, D_pad=D_pad))


# ------------------------------------------ Forward pass ------------------------------------------
def bsg_acronym_expander_forward(params, sf_ids, section_ids, category_ids, context_ids,
                                 lf_ids, target_lf_ids, lf_token_ct, num_outputs, num_contexts):
    dims = params["dims"]
    E_pad, H_pad, D_pad, D = dims["E_pad"], dims["H_pad"], dims["D_pad"], dims["D"]

    B, C = context_ids.shape
    _, M, L = lf_ids.shape

    # Batch tiling: aim for >= 2 grid blocks (megacore sharding + double-buffer pipelining).
    B_pad0 = _round_up(B, 8)
    TB = max(8, min(128, _round_up(_cdiv(B_pad0, 4), 8)))
    B_pad = _round_up(B_pad0, TB)
    if B_pad // TB < 2:
        B_pad = 2 * TB
    C_pad = _round_up(C, 8)
    M_pad = _round_up(M, 8)

    # Up to three center-id sets batched into ONE kernel launch (host-side branching
    # mirrors the torch `len(ids.nonzero()) > 0` checks on concrete inputs).
    center_sets = [sf_ids]
    if int(np.count_nonzero(np.asarray(section_ids))) > 0:
        center_sets.append(section_ids)
    if int(np.count_nonzero(np.asarray(category_ids))) > 0:
        center_sets.append(category_ids)
    K = len(center_sets)
    center_ids = jnp.stack(center_sets, axis=0)                          # (K, B)

    enc_emb = params["enc_embeddings"]                                    # (V, E_pad) bf16
    centers_e = jnp.take(enc_emb, center_ids, axis=0)                     # (K, B, E_pad) bf16
    centers_e = jnp.pad(centers_e, ((0, 0), (0, B_pad - B), (0, 0)))

    ctx_e = jnp.take(enc_emb, context_ids, axis=0)                        # (B, C, E_pad) bf16
    ctx_e = jnp.pad(ctx_e, ((0, B_pad - B), (0, C_pad - C), (0, 0)))
    ctx_flat = ctx_e.reshape(B_pad * C_pad, E_pad)                        # matmul-native layout

    num_ctx_p = jnp.pad(num_contexts.astype(jnp.int32), (0, B_pad - B))
    keep = (jax.lax.broadcasted_iota(jnp.int32, (B_pad, C_pad), 1)
            < num_ctx_p[:, None]).astype(jnp.float32)                     # mask_2D complement

    # LF priors: gather from the UNPADDED tables and pre-reduce over L at true D in the
    # wrapper (the kernel only sees the (B,M,D)-shaped aggregates -> far less HBM/VMEM).
    lf_mu_g = jnp.take(params["embeddings_mu"], lf_ids, axis=0)           # (B, M, L, D)
    lf_mu_sum = jnp.sum(lf_mu_g, axis=2)                                  # id-0 rows are zero
    lf_ls_g = jnp.take(params["embeddings_log_sigma"], lf_ids, axis=0)[..., 0]   # (B, M, L)
    lf_sig_sum = jnp.sum(jnp.exp(lf_ls_g), axis=-1)                       # id 0 -> exp(0)=1 (torch padding_idx)
    norm = jnp.maximum(lf_token_ct.astype(jnp.float32), 1.0)              # clamp_min(1.0)
    lf_mu_bar = lf_mu_sum / norm[..., None]
    lf_sig_bar = lf_sig_sum / norm
    lf_mu_bar = jnp.pad(lf_mu_bar, ((0, B_pad - B), (0, M_pad - M), (0, D_pad - D)))
    lf_sig_bar = jnp.pad(lf_sig_bar, ((0, B_pad - B), (0, M_pad - M)))

    num_out_p = jnp.pad(num_outputs.astype(jnp.int32), (0, B_pad - B))
    out_mask = (jax.lax.broadcasted_iota(jnp.int32, (B_pad, M_pad), 1)
                >= num_out_p[:, None]).astype(jnp.float32)

    kernel = _make_fused_kernel(K=K, TB=TB, C_pad=C_pad, M_pad=M_pad,
                                E_pad=E_pad, H_pad=H_pad, D_pad=D_pad, D_true=D)

    # Explicit VMEM budget (block bytes x double-buffer + live intermediates, capped for v7x).
    blk_bytes = (K * TB * E_pad * 2 + TB * C_pad * E_pad * 2 + TB * C_pad * 4
                 + 2 * E_pad * H_pad * 2 + H_pad * D_pad * 2
                 + 8 * H_pad * 4 + 8 * D_pad * 4
                 + TB * M_pad * D_pad * 4 + 2 * TB * M_pad * 4 + TB * M_pad * 4)
    live_bytes = (2 * TB * C_pad * H_pad * 4 + K * TB * H_pad * 4
                  + K * TB * D_pad * 4 + TB * M_pad * D_pad * 4)
    vmem_limit = int(min(64 << 20, max(32 << 20, 2 * blk_bytes + live_bytes + (4 << 20))))

    flops = int(2 * (B_pad * C_pad * E_pad * H_pad
                     + K * B_pad * E_pad * H_pad
                     + K * B_pad * H_pad * D_pad))
    transcendentals = int(B_pad * (K + 2 * M_pad))
    bytes_accessed = int(centers_e.size * 2 + ctx_flat.size * 2 + keep.size * 4
                         + (params["fw_center"].size + params["fw_context"].size
                            + params["uw_packed"].size) * 2
                         + (params["fb"].size + params["head_bias"].size) * 4
                         + (lf_mu_bar.size + lf_sig_bar.size + out_mask.size) * 4
                         + B_pad * M_pad * 4)

    score_p = pl.pallas_call(
        kernel,
        out_shape=jax.ShapeDtypeStruct((B_pad, M_pad), jnp.float32),
        grid=(B_pad // TB,),
        in_specs=[
            pl.BlockSpec((K, TB, E_pad), lambda i: (0, i, 0)),            # center embeddings (bf16)
            pl.BlockSpec((TB * C_pad, E_pad), lambda i: (i, 0)),          # context embeddings (bf16, flat)
            pl.BlockSpec((TB, C_pad), lambda i: (i, 0)),                  # context keep mask
            pl.BlockSpec((E_pad, H_pad), lambda i: (0, 0)),               # fw_center (bf16)
            pl.BlockSpec((E_pad, H_pad), lambda i: (0, 0)),               # fw_context (bf16)
            pl.BlockSpec((1, H_pad), lambda i: (0, 0)),                   # fb
            pl.BlockSpec((H_pad, D_pad), lambda i: (0, 0)),               # uw_packed (mu + v head, bf16)
            pl.BlockSpec((1, D_pad), lambda i: (0, 0)),                   # head bias (ub + vb packed)
            pl.BlockSpec((TB, M_pad, D_pad), lambda i: (i, 0, 0)),        # LF mu-bar (pre-reduced over L)
            pl.BlockSpec((TB, M_pad), lambda i: (i, 0)),                  # LF sigma-bar (pre-reduced over L)
            pl.BlockSpec((TB, M_pad), lambda i: (i, 0)),                  # output mask
        ],
        out_specs=pl.BlockSpec((TB, M_pad), lambda i: (i, 0)),
        compiler_params=pltpu.CompilerParams(
            dimension_semantics=("parallel",),                            # feeds both TCs on v7x
            vmem_limit_bytes=vmem_limit),
        cost_estimate=pl.CostEstimate(flops=flops, transcendentals=transcendentals,
                                      bytes_accessed=bytes_accessed),
    )(centers_e, ctx_flat, keep,
      params["fw_center"], params["fw_context"], params["fb"],
      params["uw_packed"], params["head_bias"],
      lf_mu_bar, lf_sig_bar, out_mask)

    return score_p[:B, :M], target_lf_ids, None


if __name__ == "__main__":
    key = jax.random.PRNGKey(0)
    VOCAB, D, E, H = 50, 32, 32, 64       # vocab, latent dim, encoder input dim, encoder hidden dim
    B, C, M, L = 2, 8, 4, 3               # batch, context ids, max candidate LFs, max LF length

    pkey, ikey = jax.random.split(key)
    params = init_params(pkey, VOCAB, D, E, H)

    k1, k2, k3, k4 = jax.random.split(ikey, 4)
    sf_ids = jax.random.randint(k1, (B,), 1, VOCAB, dtype=jnp.int32)
    section_ids = jax.random.randint(k2, (B,), 1, VOCAB, dtype=jnp.int32)   # nonzero -> branch taken
    category_ids = jnp.zeros((B,), dtype=jnp.int32)                         # all zero -> branch skipped
    context_ids = jax.random.randint(k3, (B, C), 0, VOCAB, dtype=jnp.int32)
    lf_ids = jax.random.randint(k4, (B, M, L), 1, VOCAB, dtype=jnp.int32)
    # introduce padding (token id 0) and a fully-empty candidate to exercise clamp_min(1.0)
    lf_ids = lf_ids.at[:, :, 2].set(0)
    lf_ids = lf_ids.at[1, 3, :].set(0)
    lf_token_ct = jnp.sum((lf_ids != 0).astype(jnp.float32), axis=-1)       # (B, M)
    target_lf_ids = jnp.array([0, 1], dtype=jnp.int32)
    num_outputs = jnp.array([4, 3], dtype=jnp.int32)
    num_contexts = jnp.array([8, 5], dtype=jnp.int32)

    score, tgt, _ = bsg_acronym_expander_forward(
        params, sf_ids, section_ids, category_ids, context_ids,
        lf_ids, target_lf_ids, lf_token_ct, num_outputs, num_contexts)
    jax.block_until_ready(score)
    assert score.shape == (B, M) and score.dtype == jnp.float32
    assert bool(jnp.isneginf(score[1, 3]))            # masked output position
    assert bool(jnp.all(jnp.isfinite(score[0])))      # unmasked row is finite
    assert bool(jnp.all(jnp.isfinite(score[1, :3])))  # unmasked positions of row 1 are finite
    print("KERNEL_OK")
</pallas_src>

<mosaic_0001>
module attributes {stable_mosaic.version = 11 : i64} {
  func.func @kernel(%arg0: i32, %arg1: memref<2x8x128xbf16, #tpu.memory_space<vmem>>, %arg2: memref<64x128xbf16, #tpu.memory_space<vmem>>, %arg3: memref<8x8xf32, #tpu.memory_space<vmem>>, %arg4: memref<128x128xbf16, #tpu.memory_space<vmem>>, %arg5: memref<128x128xbf16, #tpu.memory_space<vmem>>, %arg6: memref<1x128xf32, #tpu.memory_space<vmem>>, %arg7: memref<128x128xbf16, #tpu.memory_space<vmem>>, %arg8: memref<1x128xf32, #tpu.memory_space<vmem>>, %arg9: memref<8x8x128xf32, #tpu.memory_space<vmem>>, %arg10: memref<8x8xf32, #tpu.memory_space<vmem>>, %arg11: memref<8x8xf32, #tpu.memory_space<vmem>>, %arg12: memref<8x8xf32, #tpu.memory_space<vmem>>) attributes {dimension_semantics = [#tpu.dimension_semantics<parallel>], iteration_bounds = array<i64: 2>, scalar_prefetch = 0 : i64, scratch_operands = 0 : i64, tpu.core_type = #tpu.core_type<tc>, window_params = [{transform_indices = @transform_0, window_bounds = array<i64: 2, 8, 128>}, {transform_indices = @transform_1, window_bounds = array<i64: 64, 128>}, {transform_indices = @transform_2, window_bounds = array<i64: 8, 8>}, {pipeline_mode = #tpu.pipeline_mode<synchronous>, transform_indices = @transform_3, window_bounds = array<i64: 128, 128>}, {pipeline_mode = #tpu.pipeline_mode<synchronous>, transform_indices = @transform_4, window_bounds = array<i64: 128, 128>}, {pipeline_mode = #tpu.pipeline_mode<synchronous>, transform_indices = @transform_5, window_bounds = array<i64: 1, 128>}, {pipeline_mode = #tpu.pipeline_mode<synchronous>, transform_indices = @transform_6, window_bounds = array<i64: 128, 128>}, {pipeline_mode = #tpu.pipeline_mode<synchronous>, transform_indices = @transform_7, window_bounds = array<i64: 1, 128>}, {transform_indices = @transform_8, window_bounds = array<i64: 8, 8, 128>}, {transform_indices = @transform_9, window_bounds = array<i64: 8, 8>}, {transform_indices = @transform_10, window_bounds = array<i64: 8, 8>}, {transform_indices = @transform_11, window_bounds = array<i64: 8, 8>}]} {
    %c0 = arith.constant 0 : index
    %c0_0 = arith.constant 0 : index
    %0 = vector.load %arg2[%c0, %c0_0] : memref<64x128xbf16, #tpu.memory_space<vmem>>, vector<64x128xbf16>
    %c0_1 = arith.constant 0 : index
    %c0_2 = arith.constant 0 : index
    %1 = vector.load %arg5[%c0_1, %c0_2] : memref<128x128xbf16, #tpu.memory_space<vmem>>, vector<128x128xbf16>
    %cst = arith.constant dense<0.000000e+00> : vector<64x128xf32>
    %2 = tpu.matmul %0, %1, %cst {dimension_numbers = #tpu.dot_dimension_numbers<[1], [0], [0], [1], [0, 0, 1, 1], [], []>} : vector<64x128xbf16>, vector<128x128xbf16>, vector<64x128xf32> -> vector<64x128xf32>
    %3 = vector.shape_cast %2 : vector<64x128xf32> to vector<8x8x128xf32>
    %c0_3 = arith.constant 0 : index
    %c0_4 = arith.constant 0 : index
    %c0_5 = arith.constant 0 : index
    %4 = vector.load %arg1[%c0_3, %c0_4, %c0_5] : memref<2x8x128xbf16, #tpu.memory_space<vmem>>, vector<2x8x128xbf16>
    %5 = vector.shape_cast %4 : vector<2x8x128xbf16> to vector<16x128xbf16>
    %c0_6 = arith.constant 0 : index
    %c0_7 = arith.constant 0 : index
    %6 = vector.load %arg4[%c0_6, %c0_7] : memref<128x128xbf16, #tpu.memory_space<vmem>>, vector<128x128xbf16>
    %cst_8 = arith.constant dense<0.000000e+00> : vector<16x128xf32>
    %7 = tpu.matmul %5, %6, %cst_8 {dimension_numbers = #tpu.dot_dimension_numbers<[1], [0], [0], [1], [0, 0, 1, 1], [], []>} : vector<16x128xbf16>, vector<128x128xbf16>, vector<16x128xf32> -> vector<16x128xf32>
    %8 = vector.shape_cast %7 : vector<16x128xf32> to vector<2x8x128xf32>
    %c0_9 = arith.constant 0 : index
    %c0_10 = arith.constant 0 : index
    %9 = vector.load %arg6[%c0_9, %c0_10] : memref<1x128xf32, #tpu.memory_space<vmem>>, vector<1x128xf32>
    %10 = vector.shape_cast %9 : vector<1x128xf32> to vector<1x1x128xf32>
    %11 = vector.broadcast %10 : vector<1x1x128xf32> to vector<2x8x128xf32>
    %12 = arith.addf %8, %11 : vector<2x8x128xf32>
    %c0_11 = arith.constant 0 : index
    %c0_12 = arith.constant 0 : index
    %13 = vector.load %arg3[%c0_11, %c0_12] : memref<8x8xf32, #tpu.memory_space<vmem>>, vector<8x8xf32>
    %14 = vector.shape_cast %13 : vector<8x8xf32> to vector<8x8x1xf32>
    %15 = vector.extract_strided_slice %12 {offsets = [0, 0, 0], sizes = [1, 8, 128], strides = [1, 1, 1]} : vector<2x8x128xf32> to vector<1x8x128xf32>
    %16 = vector.shape_cast %15 : vector<1x8x128xf32> to vector<8x128xf32>
    %17 = vector.shape_cast %16 : vector<8x128xf32> to vector<8x1x128xf32>
    %18 = vector.broadcast %17 : vector<8x1x128xf32> to vector<8x8x128xf32>
    %19 = arith.addf %3, %18 : vector<8x8x128xf32>
    %cst_13 = arith.constant 0.000000e+00 : f32
    %20 = vector.broadcast %cst_13 : f32 to vector<8x8x128xf32>
    %21 = arith.maximumf %19, %20 : vector<8x8x128xf32>
    %22 = vector.broadcast %14 : vector<8x8x1xf32> to vector<8x8x128xf32>
    %23 = arith.mulf %21, %22 : vector<8x8x128xf32>
    %cst_14 = arith.constant dense<0.000000e+00> : vector<8x128xf32>
    %24 = vector.multi_reduction <add>, %23, %cst_14 [1] : vector<8x8x128xf32> to vector<8x128xf32>
    %25 = vector.extract_strided_slice %12 {offsets = [1, 0, 0], sizes = [1, 8, 128], strides = [1, 1, 1]} : vector<2x8x128xf32> to vector<1x8x128xf32>
    %26 = vector.shape_cast %25 : vector<1x8x128xf32> to vector<8x128xf32>
    %27 = vector.shape_cast %26 : vector<8x128xf32> to vector<8x1x128xf32>
    %28 = vector.broadcast %27 : vector<8x1x128xf32> to vector<8x8x128xf32>
    %29 = arith.addf %3, %28 : vector<8x8x128xf32>
    %cst_15 = arith.constant 0.000000e+00 : f32
    %30 = vector.broadcast %cst_15 : f32 to vector<8x8x128xf32>
    %31 = arith.maximumf %29, %30 : vector<8x8x128xf32>
    %32 = vector.broadcast %14 : vector<8x8x1xf32> to vector<8x8x128xf32>
    %33 = arith.mulf %31, %32 : vector<8x8x128xf32>
    %cst_16 = arith.constant dense<0.000000e+00> : vector<8x128xf32>
    %34 = vector.multi_reduction <add>, %33, %cst_16 [1] : vector<8x8x128xf32> to vector<8x128xf32>
    %35 = tpu.concatenate %24, %34 in 0 : vector<8x128xf32>, vector<8x128xf32> -> vector<16x128xf32>
    %36 = arith.truncf %35 : vector<16x128xf32> to vector<16x128xbf16>
    %c0_17 = arith.constant 0 : index
    %c0_18 = arith.constant 0 : index
    %37 = vector.load %arg7[%c0_17, %c0_18] : memref<128x128xbf16, #tpu.memory_space<vmem>>, vector<128x128xbf16>
    %cst_19 = arith.constant dense<0.000000e+00> : vector<16x128xf32>
    %38 = tpu.matmul %36, %37, %cst_19 {dimension_numbers = #tpu.dot_dimension_numbers<[1], [0], [0], [1], [0, 0, 1, 1], [], []>} : vector<16x128xbf16>, vector<128x128xbf16>, vector<16x128xf32> -> vector<16x128xf32>
    %c0_20 = arith.constant 0 : index
    %c0_21 = arith.constant 0 : index
    %39 = vector.load %arg8[%c0_20, %c0_21] : memref<1x128xf32, #tpu.memory_space<vmem>>, vector<1x128xf32>
    %40 = vector.broadcast %39 : vector<1x128xf32> to vector<16x128xf32>
    %41 = arith.addf %38, %40 : vector<16x128xf32>
    %42 = vector.shape_cast %41 : vector<16x128xf32> to vector<2x8x128xf32>
    %43 = tpu.iota {dimensions = array<i32: 2>} : vector<1x1x128xi32>
    %c32_i32 = arith.constant 32 : i32
    %44 = vector.broadcast %c32_i32 : i32 to vector<1x1x128xi32>
    %45 = arith.cmpi eq, %43, %44 : vector<1x1x128xi32>
    %cst_22 = arith.constant 0.000000e+00 : f32
    %46 = vector.shape_cast %45 : vector<1x1x128xi1> to vector<1x1x128xi1>
    %47 = vector.broadcast %46 : vector<1x1x128xi1> to vector<2x8x128xi1>
    %48 = vector.broadcast %cst_22 : f32 to vector<2x8x128xf32>
    %49 = arith.select %47, %48, %42 : vector<2x8x128xi1>, vector<2x8x128xf32>
    %cst_23 = arith.constant dense<0.000000e+00> : vector<8x128xf32>
    %50 = vector.multi_reduction <add>, %49, %cst_23 [0] : vector<2x8x128xf32> to vector<8x128xf32>
    %cst_24 = arith.constant 5.000000e-01 : f32
    %51 = vector.broadcast %cst_24 : f32 to vector<8x128xf32>
    %52 = arith.mulf %50, %51 : vector<8x128xf32>
    %cst_25 = arith.constant 0.000000e+00 : f32
    %53 = vector.shape_cast %45 : vector<1x1x128xi1> to vector<1x1x128xi1>
    %54 = vector.broadcast %53 : vector<1x1x128xi1> to vector<2x8x128xi1>
    %55 = vector.broadcast %cst_25 : f32 to vector<2x8x128xf32>
    %56 = arith.select %54, %42, %55 : vector<2x8x128xi1>, vector<2x8x128xf32>
    %cst_26 = arith.constant dense<0.000000e+00> : vector<2x8xf32>
    %57 = vector.multi_reduction <add>, %56, %cst_26 [2] : vector<2x8x128xf32> to vector<2x8xf32>
    %58 = vector.shape_cast %57 : vector<2x8xf32> to vector<2x8x1xf32>
    %59 = math.exp %58 : vector<2x8x1xf32>
    %cst_27 = arith.constant dense<0.000000e+00> : vector<8x1xf32>
    %60 = vector.multi_reduction <add>, %59, %cst_27 [0] : vector<2x8x1xf32> to vector<8x1xf32>
    %cst_28 = arith.constant 5.000000e-01 : f32
    %61 = vector.broadcast %cst_28 : f32 to vector<8x1xf32>
    %62 = arith.mulf %60, %61 : vector<8x1xf32>
    %c0_29 = arith.constant 0 : index
    %c0_30 = arith.constant 0 : index
    %c0_31 = arith.constant 0 : index
    %63 = vector.load %arg9[%c0_29, %c0_30, %c0_31] : memref<8x8x128xf32, #tpu.memory_space<vmem>>, vector<8x8x128xf32>
    %c0_32 = arith.constant 0 : index
    %c0_33 = arith.constant 0 : index
    %64 = vector.load %arg10[%c0_32, %c0_33] : memref<8x8xf32, #tpu.memory_space<vmem>>, vector<8x8xf32>
    %cst_34 = arith.constant 9.99999993E-9 : f32
    %65 = vector.broadcast %cst_34 : f32 to vector<8x8xf32>
    %66 = arith.maximumf %64, %65 : vector<8x8xf32>
    %67 = vector.shape_cast %52 : vector<8x128xf32> to vector<8x1x128xf32>
    %68 = vector.broadcast %67 : vector<8x1x128xf32> to vector<8x8x128xf32>
    %69 = arith.subf %68, %63 : vector<8x8x128xf32>
    %70 = arith.mulf %69, %69 : vector<8x8x128xf32>
    %cst_35 = arith.constant dense<0.000000e+00> : vector<8x8xf32>
    %71 = vector.multi_reduction <add>, %70, %cst_35 [2] : vector<8x8x128xf32> to vector<8x8xf32>
    %72 = math.log %66 : vector<8x8xf32>
    %73 = math.log %62 : vector<8x1xf32>
    %74 = vector.broadcast %73 : vector<8x1xf32> to vector<8x8xf32>
    %75 = arith.subf %72, %74 : vector<8x8xf32>
    %cst_36 = arith.constant 3.200000e+01 : f32
    %76 = vector.broadcast %cst_36 : f32 to vector<8x8xf32>
    %77 = arith.mulf %76, %75 : vector<8x8xf32>
    %cst_37 = arith.constant 3.200000e+01 : f32
    %78 = vector.broadcast %cst_37 : f32 to vector<8x1xf32>
    %79 = arith.mulf %78, %62 : vector<8x1xf32>
    %80 = arith.mulf %79, %62 : vector<8x1xf32>
    %81 = vector.broadcast %80 : vector<8x1xf32> to vector<8x8xf32>
    %82 = arith.addf %71, %81 : vector<8x8xf32>
    %cst_38 = arith.constant 2.000000e+00 : f32
    %83 = vector.broadcast %cst_38 : f32 to vector<8x8xf32>
    %84 = arith.mulf %83, %66 : vector<8x8xf32>
    %85 = arith.mulf %84, %66 : vector<8x8xf32>
    %86 = arith.divf %82, %85 : vector<8x8xf32>
    %87 = arith.addf %77, %86 : vector<8x8xf32>
    %cst_39 = arith.constant 1.600000e+01 : f32
    %88 = vector.broadcast %cst_39 : f32 to vector<8x8xf32>
    %89 = arith.subf %87, %88 : vector<8x8xf32>
    %c0_40 = arith.constant 0 : index
    %c0_41 = arith.constant 0 : index
    %90 = vector.load %arg11[%c0_40, %c0_41] : memref<8x8xf32, #tpu.memory_space<vmem>>, vector<8x8xf32>
    %cst_42 = arith.constant 0.000000e+00 : f32
    %91 = vector.broadcast %cst_42 : f32 to vector<8x8xf32>
    %92 = arith.cmpf ogt, %90, %91 : vector<8x8xf32>
    %cst_43 = arith.constant 0.000000e+00 : f32
    %93 = vector.broadcast %cst_43 : f32 to vector<8x8xf32>
    %94 = arith.subf %93, %89 : vector<8x8xf32>
    %cst_44 = arith.constant 0xFF800000 : f32
    %95 = vector.broadcast %cst_44 : f32 to vector<8x8xf32>
    %96 = arith.select %92, %95, %94 : vector<8x8xi1>, vector<8x8xf32>
    %c0_45 = arith.constant 0 : index
    %c0_46 = arith.constant 0 : index
    %97 = vector.load %arg12[%c0_45, %c0_46] : memref<8x8xf32, #tpu.memory_space<vmem>>, vector<8x8xf32>
    tpu.vector_store %arg12[%c0_45, %c0_46], %96 {strides = array<i32>} : memref<8x8xf32, #tpu.memory_space<vmem>>, vector<8x8xf32>,
    return
  }
  func.func @transform_0(%arg0: i32) -> (i32, i32, i32) {
    %c0_i32 = arith.constant 0 : i32
    %c0_i32_0 = arith.constant 0 : i32
    %c0_i32_1 = arith.constant 0 : i32
    return %c0_i32, %arg0, %c0_i32_0 : i32, i32, i32
  }
  func.func @transform_1(%arg0: i32) -> (i32, i32) {
    %c0_i32 = arith.constant 0 : i32
    %c0_i32_0 = arith.constant 0 : i32
    return %arg0, %c0_i32 : i32, i32
  }
  func.func @transform_2(%arg0: i32) -> (i32, i32) {
    %c0_i32 = arith.constant 0 : i32
    %c0_i32_0 = arith.constant 0 : i32
    return %arg0, %c0_i32 : i32, i32
  }
  func.func @transform_3(%arg0: i32) -> (i32, i32) {
    %c0_i32 = arith.constant 0 : i32
    %c0_i32_0 = arith.constant 0 : i32
    %c0_i32_1 = arith.constant 0 : i32
    return %c0_i32, %c0_i32_0 : i32, i32
  }
  func.func @transform_4(%arg0: i32) -> (i32, i32) {
    %c0_i32 = arith.constant 0 : i32
    %c0_i32_0 = arith.constant 0 : i32
    %c0_i32_1 = arith.constant 0 : i32
    return %c0_i32, %c0_i32_0 : i32, i32
  }
  func.func @transform_5(%arg0: i32) -> (i32, i32) {
    %c0_i32 = arith.constant 0 : i32
    %c0_i32_0 = arith.constant 0 : i32
    %c0_i32_1 = arith.constant 0 : i32
    return %c0_i32, %c0_i32_0 : i32, i32
  }
  func.func @transform_6(%arg0: i32) -> (i32, i32) {
    %c0_i32 = arith.constant 0 : i32
    %c0_i32_0 = arith.constant 0 : i32
    %c0_i32_1 = arith.constant 0 : i32
    return %c0_i32, %c0_i32_0 : i32, i32
  }
  func.func @transform_7(%arg0: i32) -> (i32, i32) {
    %c0_i32 = arith.constant 0 : i32
    %c0_i32_0 = arith.constant 0 : i32
    %c0_i32_1 = arith.constant 0 : i32
    return %c0_i32, %c0_i32_0 : i32, i32
  }
  func.func @transform_8(%arg0: i32) -> (i32, i32, i32) {
    %c0_i32 = arith.constant 0 : i32
    %c0_i32_0 = arith.constant 0 : i32
    %c0_i32_1 = arith.constant 0 : i32
    return %arg0, %c0_i32, %c0_i32_0 : i32, i32, i32
  }
  func.func @transform_9(%arg0: i32) -> (i32, i32) {
    %c0_i32 = arith.constant 0 : i32
    %c0_i32_0 = arith.constant 0 : i32
    return %arg0, %c0_i32 : i32, i32
  }
  func.func @transform_10(%arg0: i32) -> (i32, i32) {
    %c0_i32 = arith.constant 0 : i32
    %c0_i32_0 = arith.constant 0 : i32
    return %arg0, %c0_i32 : i32, i32
  }
  func.func @transform_11(%arg0: i32) -> (i32, i32) {
    %c0_i32 = arith.constant 0 : i32
    %c0_i32_0 = arith.constant 0 : i32
    return %arg0, %c0_i32 : i32, i32
  }
}

</mosaic_0001>

<bundles_post_ra>
// kernel: tpu_custom_call.1
= control target key start
LH: loop header
LB: loop body
LE: loop exit
PB: predicated region body
PF: predicated region fallthrough
CT: control target
= control target key end

     0   :  { %s2905_s0 = inlined_call_operand.hbm [shape: bf16[2,16,128], index: 0, kind: input, shape index: {}]   ;;  %s2906_s1 = inlined_call_operand.vmem [shape: bf16[128,128], index: 1, kind: input, shape index: {}]   ;;  %s2907_s2 = inlined_call_operand.vmem [shape: f32[16,8], index: 2, kind: input, shape index: {}]   ;;  %s2908_s3 = inlined_call_operand.hbm [shape: bf16[128,128], index: 3, kind: input, shape index: {}]   ;;  %s2909_s4 = inlined_call_operand.hbm [shape: bf16[128,128], index: 4, kind: input, shape index: {}]   ;;  %s2910_s5 = inlined_call_operand.vmem [shape: f32[1,128], index: 5, kind: input, shape index: {}]   ;;  %s2911_s6 = inlined_call_operand.hbm [shape: bf16[128,128], index: 6, kind: input, shape index: {}]   ;;  %s2912_s7 = inlined_call_operand.vmem [shape: f32[1,128], index: 7, kind: input, shape index: {}]   ;;  %s2913_s8 = inlined_call_operand.hbm [shape: f32[16,8,128], index: 8, kind: input, shape index: {}]   ;;  %s2914_s9 = inlined_call_operand.vmem [shape: f32[16,8], index: 9, kind: input, shape index: {}]   ;;  %s2915_s10 = inlined_call_operand.vmem [shape: f32[16,8], index: 10, kind: input, shape index: {}]   ;;  %s2916_s11 = inlined_call_operand.vmem [shape: f32[16,8], index: 11, kind: output, shape index: {}]  }
   0x1   :  { %2923 = sst [smem:[#allocation16_spill]] %s2910_s5 }
   0x2   :  { %2924 = sst [smem:[#allocation17_spill]] %s2912_s7 }
   0x3   :  { %2925 = sst [smem:[#allocation18_spill]] %s2914_s9 }
   0x4   :  { %2926 = sst [smem:[#allocation19_spill]] %s2915_s10 }
   0x5   :  { %2927 = sst [smem:[#allocation20_spill]] %s2916_s11 }
   0x6   :  { %16 = vsyncpa [#allocation3], 0 }
   0x7   :  { %18 = vsyncpa [#allocation3 + $0x1], 0 }
   0x8   :  { %19 = vsyncpa [#allocation5], 0 }
   0x9   :  { %20 = vsyncpa [#allocation8], 0  ;;  %s2456_s17 = smov 0   ;;  %s2458_s18 = smov 0  }
   0xa   :  { %s2460_s19 = smov 0   ;;  %s2462_s20 = smov 0  }
   0xb LB: > { %s2475_s21 = sadd.s32 4294967295, %s2381_s20   ;;  %s2478_s22 = sadd.s32 1, %s2381_s20   ;;  %s2381_s20 = sphi %s2462_s20, %s2948_s20   ;;  %s2377_s19 = sphi %s2460_s19, %s2952_s19   ;;  %s2373_s18 = sphi %s2458_s18, %s2951_s18   ;;  %s2369_s17 = sphi %s2456_s17, %s2950_s17  }
   0xc   : > { %2928 = sst [smem:[#allocation14_spill]] %s2478_s22  ;;  %s30_s23 = ssub.s32 %s2381_s20, %s2478_s22 }
   0xd   : > { %s33_s24 = sadd.s32 1, %s2377_s19  ;;  %p31_p0 = scmp.eq.s32.totalorder %s30_s23, 0 }
   0xe   : > { %p40_p1 = scmp.ne.s32.totalorder %s2377_s19, %s2373_s18  ;;  %p41_p2 = scmp.eq.s32.totalorder %s2381_s20, 0 }
   0xf   : > { %p46_p3 = scmp.ne.s32.totalorder %s2373_s18, %s2369_s17  ;;  %p2917_p5 = scmp.eq.s32.totalorder %s2475_s21, 0 }
  0x10   : > { %s2488_s25 = scalar_select %p31_p0, %s2377_s19, %s33_s24  }
  0x11   : > { %p2490_p4 = por %p41_p2, %p40_p1  ;;  %p1912_p6 = scmp.ge.s32.totalorder %s2381_s20, 1 }
  0x12   : > { %2929 = sst [smem:[#allocation15_spill]] %s2488_s25  ;;  %p318_p7 = scmp.lt.s32.totalorder %s2381_s20, 3 }
  0x13   : > { %p2499_p8 = por %p2917_p5, %p46_p3  ;;  %s2383_s29 = smov [#allocation4]  }
  0x14   : > { %p2503_p9 = pnand %p1912_p6, %p318_p7  ;;  %s330_s30 = sshll.u32 %s2383_s29, 4  ;;  %s331_s30 = int_to_ptr.vmem [resolvable:$true] %s330_s30 }
  0x15   : > { %s2931_s27 = scalar_select %p2499_p8, 1, 0 }
  0x16   : > { %s2932_s28 = scalar_select %p2503_p9, 1, 0 }
  0x17   : > { %p2079_p10 = pneg %p2503_p9  ;;  %p2099_p12 = scmp.lt.s32.totalorder %s2381_s20, 2 }
  0x18   : > { %s376_s13 = sand.u32 1, %s2381_s20   ;;  %s378_s14 = sand.u32 1, %s2377_s19  }
  0x19   : > { %p2511_p11 = pnand %p2079_p10, %p2917_p5  ;;  %p2520_p13 = pnand %p2099_p12, %p2490_p4 }
  0x1a   : > { %s2212_s16 = scalar_lea.vmem %s331_s30, 1024  ;;  %p2220_p6 = scmp.lt.s32.totalorder %s331_s30, %s331_s30 }
  0x1b   : > { %p2920_p0 = pneg %p2511_p11  ;;  %p2213_p1 = scmp.ne.s32.totalorder %s331_s30, %s2212_s16 }
  0x1c   : > { %p2221_p7 = scmp.lt.s32.totalorder %s2212_s16, %s2212_s16 }
  0x1d   : > { %p2215_p2 = pnand %p2213_p1, %p2920_p0 }
  0x1e   : > { %p2222_p10 = por %p2221_p7, %p2220_p6 }
  0x1f   : > { %p2216_p3 = pneg %p2215_p2 }
  0x21   : > { %p2223_p5 = pnand %p2222_p10, %p2216_p3 }
  0x23   : > { %2226 = shalt.err (!%p2223_p5)
}
  0x24   : > { %s2384_s17 = smov 64   ;;  %s2385_s23 = smov 4  }
  0x25   : > { %2082 = dma.hbm_to_vmem [thread:$0]  (!%p2511_p11), %s2908_s3, 1024, %s331_s30, [#allocation5], %s2384_s17, %s2384_s17, %s2385_s23  }
  0x26   : > { %s1917_s29 = sshll.u32 %s378_s14, 3  ;;  %s1918_s16 = sshll.u32 %s2381_s20, 6 }
  0x27   : > { %s2543_s11 = scalar_lea.hbm %s2905_s0, %s1918_s16  ;;  %s380_s10 = scalar_lea.vmem [#allocation2], %s1917_s29 }
  0x28   : > { %s386_s7 = sshll.u32 %s380_s10, 4  ;;  %s2547_s5 = scalar_lea.sflag [#allocation3], %s376_s13  ;;  %s2545_s7 = int_to_ptr.vmem [resolvable:$true] %s386_s7 }
  0x29   : > { %s2227_s9 = scalar_lea.hbm %s2543_s11, 128  ;;  %p2229_p5 = pneg %p2520_p13 }
  0x2a   : > { %p2228_p4 = scmp.ne.s32.totalorder %s2543_s11, %s2227_s9  ;;  %s2232_s30 = scalar_lea.hbm %s2905_s0, 256 }
  0x2b   : > { %p2233_p2 = scmp.lt.s32.totalorder %s2543_s11, %s2905_s0  ;;  %p2234_p3 = scmp.lt.s32.totalorder %s2232_s30, %s2227_s9 }
  0x2c   : > { %p2230_p12 = pnand %p2229_p5, %p2228_p4 }
  0x2d   : > { %p2235_p6 = por %p2234_p3, %p2233_p2 }
  0x2e   : > { %p2231_p1 = pneg %p2230_p12 }
  0x30   : > { %p2236_p7 = pnand %p2235_p6, %p2231_p1 }
  0x32   : > { %2239 = shalt.err (!%p2236_p7)
}
  0x33   : > { %s2240_s10 = scalar_lea.vmem %s2545_s7, 128  ;;  %s2386_s13 = smov [#allocation2]  }
  0x34   : > { %p2241_p10 = scmp.ne.s32.totalorder %s2545_s7, %s2240_s10  ;;  %s2245_s29 = sshll.u32 %s2386_s13, 4  ;;  %s2246_s29 = int_to_ptr.vmem [resolvable:$false] %s2245_s29 }
  0x35   : > { %s2247_s16 = scalar_lea.vmem %s2246_s29, 256  ;;  %p2248_p0 = scmp.lt.s32.totalorder %s2545_s7, %s2246_s29 }
  0x36   : > { %p2243_p4 = pnand %p2241_p10, %p2229_p5  ;;  %p2249_p8 = scmp.lt.s32.totalorder %s2247_s16, %s2240_s10 }
  0x38   : > { %p2244_p12 = pneg %p2243_p4  ;;  %p2250_p9 = por %p2249_p8, %p2248_p0 }
  0x3a   : > { %p2251_p2 = pnand %p2250_p9, %p2244_p12 }
  0x3c   : > { %2254 = shalt.err (!%p2251_p2)
}
  0x3d   : > { %s2387_s9 = smov 128   ;;  %s2388_s22 = smov [#allocation6]  }
  0x3e   : > { %2092 = dma.hbm_to_vmem [thread:$0]  (!%p2520_p13), %s2543_s11, 128, %s2545_s7, %s2547_s5, %s2387_s9, %s2384_s17, %s2385_s23  }
  0x3f   : > { %s343_s25 = sshll.u32 %s2388_s22, 4  ;;  %s2389_s30 = smov [#allocation7]   ;;  %s344_s25 = int_to_ptr.vmem [resolvable:$true] %s343_s25 }
  0x40   : > { %s359_s24 = sshll.u32 %s2389_s30, 4  ;;  %s2266_s26 = scalar_lea.vmem %s344_s25, 1024  ;;  %s360_s24 = int_to_ptr.vmem [resolvable:$true] %s359_s24 }
  0x41   : > { %p2267_p8 = scmp.ne.s32.totalorder %s344_s25, %s2266_s26  ;;  %p2935_p9 = pneg %p2511_p11 }
  0x42   : > { %p2274_p3 = scmp.lt.s32.totalorder %s344_s25, %s344_s25  ;;  %p2275_p6 = scmp.lt.s32.totalorder %s2266_s26, %s2266_s26 }
  0x43   : > { %p2269_p0 = pnand %p2267_p8, %p2935_p9 }
  0x44   : > { %p2276_p7 = por %p2275_p6, %p2274_p3 }
  0x45   : > { %p2270_p1 = pneg %p2269_p0 }
  0x47   : > { %p2277_p10 = pnand %p2276_p7, %p2270_p1 }
  0x49   : > { %2280 = shalt.err (!%p2277_p10)
}
  0x4a   : > { %2085 = dma.hbm_to_vmem [thread:$0]  (!%p2511_p11), %s2909_s4, 1024, %s344_s25, [#allocation5], %s2384_s17, %s2384_s17, %s2385_s23  }
  0x4b   : > { %s1919_s10 = sshll.u32 %s378_s14, 6  ;;  %s2292_s13 = scalar_lea.vmem %s360_s24, 1024 }
  0x4c   : > { %p2293_p4 = scmp.ne.s32.totalorder %s360_s24, %s2292_s13  ;;  %p2936_p12 = pmov %p2935_p9 }
  0x4d   : > { %p2300_p9 = scmp.lt.s32.totalorder %s360_s24, %s360_s24  ;;  %p2301_p0 = scmp.lt.s32.totalorder %s2292_s13, %s2292_s13 }
  0x4e   : > { %p2295_p2 = pnand %p2293_p4, %p2936_p12 }
  0x4f   : > { %p2302_p1 = por %p2301_p0, %p2300_p9 }
  0x50   : > { %p2296_p8 = pneg %p2295_p2 }
  0x52   : > { %p2303_p3 = pnand %p2302_p1, %p2296_p8 }
  0x54   : > { %2306 = shalt.err (!%p2303_p3)
}
  0x55   : > { %2088 = dma.hbm_to_vmem [thread:$0]  (!%p2511_p11), %s2911_s6, 1024, %s360_s24, [#allocation8], %s2384_s17, %s2384_s17, %s2385_s23  }
  0x56   : > { %s1968_s14 = sshll.u32 %s2381_s20, 10  ;;  %s416_s26 = scalar_lea.vmem [#allocation9], %s1919_s10 }
  0x57   : > { %s2605_s30 = scalar_lea.hbm %s2913_s8, %s1968_s14  ;;  %s423_s12 = sshll.u32 %s416_s26, 4  ;;  %s2607_s12 = int_to_ptr.vmem [resolvable:$true] %s423_s12 }
  0x58   : > { %s2307_s7 = scalar_lea.hbm %s2605_s30, 1024  ;;  %s2312_s23 = scalar_lea.hbm %s2913_s8, 2048 }
  0x59   : > { %p2308_p6 = scmp.ne.s32.totalorder %s2605_s30, %s2307_s7  ;;  %p2313_p11 = scmp.lt.s32.totalorder %s2605_s30, %s2913_s8 }
  0x5a   : > { %p2314_p4 = scmp.lt.s32.totalorder %s2312_s23, %s2307_s7 }
  0x5b   : > { %p2310_p7 = pnand %p2308_p6, %p2229_p5 }
  0x5c   : > { %p2315_p12 = por %p2314_p4, %p2313_p11 }
  0x5d   : > { %p2311_p10 = pneg %p2310_p7 }
  0x5f   : > { %p2316_p2 = pnand %p2315_p12, %p2311_p10 }
  0x61   : > { %2319 = shalt.err (!%p2316_p2)
}
  0x62   : > { %s2320_s10 = scalar_lea.vmem %s2607_s12, 1024  ;;  %s2390_s13 = smov [#allocation9]  }
  0x63   : > { %p2321_p8 = scmp.ne.s32.totalorder %s2607_s12, %s2320_s10  ;;  %s2325_s29 = sshll.u32 %s2390_s13, 4  ;;  %s2326_s29 = int_to_ptr.vmem [resolvable:$false] %s2325_s29 }
  0x64   : > { %s2327_s16 = scalar_lea.vmem %s2326_s29, 2048  ;;  %p2328_p1 = scmp.lt.s32.totalorder %s2607_s12, %s2326_s29 }
  0x65   : > { %p2323_p9 = pnand %p2321_p8, %p2229_p5  ;;  %p2329_p3 = scmp.lt.s32.totalorder %s2327_s16, %s2320_s10 }
  0x67   : > { %p2324_p0 = pneg %p2323_p9  ;;  %p2330_p6 = por %p2329_p3, %p2328_p1 }
  0x69   : > { %p2331_p7 = pnand %p2330_p6, %p2324_p0 }
  0x6b   : > { %2334 = shalt.err (!%p2331_p7)
}
  0x6c   : > { %s2391_s14 = smov 8   ;;  %p2937_p5 = scmp.ne.s32.totalorder %s2932_s28, 0 }
  0x6d   : > { %2095 = dma.hbm_to_vmem [thread:$0]  (!%p2520_p13), %s2605_s30, 1024, %s2607_s12, %s2547_s5, %s2387_s9, %s2387_s9, %s2391_s14  }
  0x6e   : > { %449 = sbr.rel (%p2937_p5) target bundleno = 966 (0x3c6), region = 64  ;;  %s451_s22 = sand.u32 (!%p2937_p5), 1, %s2475_s21  }
  0x6f   : > { %s453_s25 = sand.u32 (!%p2937_p5), 1, %s2373_s18   ;;  %s452_s7 = scalar_lea.sflag (!%p2937_p5), [#allocation3], %s451_s22 }
  0x70   : > { %s2638_s26 = sshll.u32 (!%p2937_p5), %s453_s25, 3  ;;  %p2938_p10 = scmp.ne.s32.totalorder (!%p2937_p5), %s2931_s27, 0 }
  0x71   : > { %s455_s17 = scalar_lea.vmem (!%p2937_p5), [#allocation2], %s2638_s26 }
  0x73   : > { %2352 = dma.done.wait (%p2938_p10), %s452_s7, 128  }
  0x74   : > { %2354 = vsyncadd (%p2938_p10), %s452_s7, 4294967168  ;;  %p2939_p13 = scmp.eq.s32.totalorder %s2475_s21, 0 }
  0x76   : > { %2356 = dma.done.wait (%p2939_p13), [#allocation5], 2048   ;;  %p2940_p11 = pmov %p2939_p13 }
  0x78   : > { %2358 = vsyncadd (%p2940_p11), [#allocation5], 4294965248  ;;  %p2941_p4 = pmov %p2940_p11 }
  0x7a   : > { %2360 = dma.done.wait (%p2941_p4), [#allocation8], 1024   ;;  %p2942_p12 = pmov %p2941_p4 }
  0x7b   : > { %s1927_s5 = sshll.u32 %s453_s25, 6 }
  0x7c   : > { %2362 = vsyncadd (%p2942_p12), [#allocation8], 4294966272  ;;  %s2653_s28 = scalar_lea.vmem [#allocation9], %s1927_s5 }
  0x7d   : > { %2364 = dma.done.wait (%p2938_p10), %s452_s7, 1024  }
  0x7e   : > { %2366 = vsyncadd (%p2938_p10), %s452_s7, 4294966272  ;;  %v2392_v0 = vmov 0.0   ;;  %vm2393_vm0 = vmmov 0   ;;  %s1928_s15 = sshll.u32 %s2475_s21, 3  ;;  %v2148_v1 = vld [vmem:[#allocation6 + $0x38] sm:$0xff]   ;;  %v2150_v3 = vld [vmem:[#allocation6 + $0x30] sm:$0xff]   ;;  %v844_v8 = vlaneseq }
  0x7f   : > { %2023 = vmatprep.subr.bf16.mxu1 %v2392_v0  ;;  %2039 = vmatprep.mubr.msk.bf16.mxu1 %vm2393_vm0, %v2392_v0  ;;  %v2149_v2 = vld [vmem:[#allocation4 + $0x38] sm:$0xff]   ;;  %p537_p2 = scmp.lt.s32.totalorder %s1928_s15, 15  ;;  %v2151_v4 = vld [vmem:[#allocation4 + $0x30] sm:$0xff]   ;;  %v2152_v5 = vld [vmem:[#allocation6 + $0x28] sm:$0xff]   ;;  %p542_p8 = scmp.lt.s32.totalorder %s2475_s21, 1  ;;  %vm1232_vm1 = vcmask 1041409  }
  0x80   : > { %1999 = vmatprep.subr.bf16.mxu0 %v2148_v1  ;;  %2024 = vmatpush3.bf16.msra.mxu1 %v2149_v2  ;;  %v2153_v6 = vld [vmem:[#allocation4 + $0x28] sm:$0xff]   ;;  %v2154_v7 = vld [vmem:[#allocation6 + $0x20] sm:$0xff]   ;;  %v2156_v10 = vld [vmem:[#allocation6 + $0x18] sm:$0xff]   ;;  %v2674_v12 = vshrl.u32 %v844_v8, 7  ;;  %s2943_s13 = sld [smem:[#allocation18_spill]]  ;;  %vm1234_vm2 = vcmask 1042434  }
  0x81   : > { %2000 = vmatpush3.bf16.msra.mxu0 %v2148_v1  ;;  %2025 = vmatprep.subr.bf16.mxu1 %v2392_v0  ;;  %s2954_s15 = smov (!%p537_p2, %s1928_s15), 15  ;;  %v2155_v9 = vld [vmem:[#allocation4 + $0x20] sm:$0xff]   ;;  %s2956_s21 = smov (!%p542_p8, %s2475_s21), 1  ;;  %v2157_v11 = vld [vmem:[#allocation4 + $0x18] sm:$0xff]   ;;  %v2158_v13 = vld [vmem:[#allocation6 + $0x10] sm:$0xff]   ;;  %vm1236_vm3 = vcmask 1043459  }
  0x82   : > { %2001 = vmatprep.subr.bf16.mxu0 %v2150_v3  ;;  %s1929_s27 = sshll.u32 %s2954_s15, 2  ;;  %s2676_s20 = sshll.u32 %s2956_s21, 3  ;;  %v2685_v15 = vsub.s32 0, %v2674_v12  ;;  %v2688_v16 = vsub.s32 2, %v2674_v12  ;;  %v2159_v17 = vld [vmem:[#allocation4 + $0x10] sm:$0xff]   ;;  %v2160_v18 = vld [vmem:[#allocation6 + $0x8] sm:$0xff]  }
  0x83   : > { %s2671_s12 = scalar_lea.vmem %s2906_s1, %s1929_s27  ;;  %s545_s11 = scalar_lea.vmem %s2907_s2, %s2676_s20  ;;  %v2692_v20 = vsub.s32 1, %v2674_v12  ;;  %v2695_v21 = vsub.s32 3, %v2674_v12  ;;  %v2161_v22 = vld [vmem:[#allocation4 + $0x8] sm:$0xff]   ;;  %v2700_v25 = vsub.s32 4, %v2674_v12  ;;  %v2162_v26 = vld [vmem:[#allocation6] sm:$0xff]   ;;  %v2704_v27 = vsub.s32 5, %v2674_v12 }
  0x84   : > { %2026 = vmatpush3.bf16.msra.mxu1 %v2151_v4  ;;  %v2164_v14 = vld [vmem:[%s2671_s12] sm:$0xff]   ;;  %v2163_v28 = vld [vmem:[#allocation4] sm:$0xff]   ;;  %v2712_v33 = vsub.s32 6, %v2674_v12  ;;  %v2715_v34 = vsub.s32 7, %v2674_v12  ;;  %v2166_v36 = vld [vmem:[%s2671_s12 + $0x8] sm:$0xff]   ;;  %s2944_s22 = sld [smem:[#allocation16_spill]] }
  0x85   : > { %2002 = vmatpush3.bf16.msra.mxu0 %v2150_v3  ;;  %2027 = vmatprep.subr.bf16.mxu1 %v2392_v0  ;;  %v843_v19 = vld [vmem:[%s545_s11] sm:$0xff]  ;;  %v2167_v37 = vld [vmem:[%s2671_s12 + $0x10] sm:$0xff]   ;;  %v2168_v40 = vld [vmem:[%s2671_s12 + $0x18] sm:$0xff]   ;;  %v2394_v59 = vmov 1966171168   ;;  %vm1238_vm4 = vcmask 1044484  }
  0x86   : > { %2003 = vmatprep.subr.bf16.mxu0 %v2152_v5  ;;  %2015 = vmatprep.mubr.bf16.mxu0 %v2164_v14  ;;  %v847_v23 = vrot.slane %v843_v19, %v2685_v15  ;;  %v861_v24 = vrot.slane %v843_v19, %v2688_v16  ;;  %v854_v29 = vrot.slane %v843_v19, %v2692_v20  ;;  %v2165_v35 = vld [vmem:[%s455_s17] sm:$0xff]   ;;  %v2171_v43 = vld [vmem:[#allocation7 + $0x28] sm:$0xff]   ;;  %s550_s29 = scalar_lea.vmem %s2943_s13, %s2676_s20  ;;  %v2172_v44 = vld [vmem:[#allocation7 + $0x20] sm:$0xff]   ;;  %v903_v60 = vunpack.c.l.s4 %v2394_v59  ;;  %s2945_s7 = sld [smem:[#allocation17_spill]] }
  0x87   : > { %v868_v30 = vrot.slane %v843_v19, %v2695_v21  ;;  %v875_v31 = vrot.slane %v843_v19, %v2700_v25  ;;  %v882_v32 = vrot.slane %v843_v19, %v2704_v27  ;;  %v889_v38 = vrot.slane %v843_v19, %v2712_v33  ;;  %v2169_v41 = vld [vmem:[#allocation7 + $0x38] sm:$0xff]   ;;  %v2170_v42 = vld [vmem:[#allocation7 + $0x30] sm:$0xff]   ;;  %v2175_v51 = vld [vmem:[#allocation7 + $0x8] sm:$0xff]   ;;  %s2947_s30 = sld [smem:[#allocation20_spill]] }
  0x88   : > { %2028 = vmatpush3.bf16.msra.mxu1 %v2153_v6  ;;  %849 = vbcast.lane.b32.xlu0 %v847_v23, 256  ;;  %v896_v39 = vrot.slane %v843_v19, %v2715_v34  ;;  %v1405_v45 = vld [vmem:[%s550_s29] sm:$0xff]  ;;  %v2173_v47 = vld [vmem:[#allocation7 + $0x18] sm:$0xff]   ;;  %v2176_v52 = vld [vmem:[#allocation7] sm:$0xff]   ;;  %v904_v61 = vunpack.c.0.s8 %v903_v60  ;;  %vm1240_vm5 = vcmask 1045509   ;;  %vm1242_vm6 = vcmask 1046534  }
  0x89   : > { %2004 = vmatpush3.bf16.msra.mxu0 %v2152_v5  ;;  %2029 = vmatprep.subr.bf16.mxu1 %v2392_v0  ;;  %v2735_v46 = vmax.f32 %v1405_v45, 1e-08  ;;  %v2174_v49 = vld [vmem:[#allocation7 + $0x10] sm:$0xff]   ;;  %vm1244_vm7 = vcmask 1047559   ;;  %vm1747_vm10 = vcmask 64512  }
  0x8a   : > { %2005 = vmatprep.subr.bf16.mxu0 %v2154_v7  ;;  %863 = vbcast.lane.b32.xlu1 %v861_v24, 256  ;;  %v1955_v62 = vld [vmem:[%s2944_s22] ss:$0 sm:$0xff]  ;;  %v2760_v63 = vsub.s32 %v904_v61, %v2674_v12 }
  0x8b   : > { %v1586_v48 = vmul.f32 2.0, %v2735_v46 }
  0x8c   : > { %2030 = vmatpush3.bf16.msra.mxu1 %v2155_v9  ;;  %856 = vbcast.lane.b32.xlu0 %v854_v29, 256 }
  0x8d   : > { %2006 = vmatpush3.bf16.msra.mxu0 %v2154_v7  ;;  %2031 = vmatprep.subr.bf16.mxu1 %v2392_v0  ;;  %v2741_v50 = vmul.f32 %v1586_v48, %v2735_v46  ;;  %s558_s12 = scalar_lea.vmem %s2947_s30, %s2676_s20 }
  0x8e   : > { %2007 = vmatprep.subr.bf16.mxu0 %v2156_v10  ;;  %870 = vbcast.lane.b32.xlu1 %v868_v30, 256 }
  0x8f   : > { %v1592_v53 = vrot.slane %v2741_v50, %v2685_v15  ;;  %v1599_v54 = vrot.slane %v2741_v50, %v2692_v20  ;;  %v1613_v55 = vrot.slane %v2741_v50, %v2695_v21  ;;  %v1606_v56 = vrot.slane %v2741_v50, %v2688_v16 }
  0x90   : > { %2032 = vmatpush3.bf16.msra.mxu1 %v2157_v11  ;;  %877 = vbcast.lane.b32.xlu0 %v875_v31, 256  ;;  %v1634_v57 = vrot.slane %v2741_v50, %v2712_v33  ;;  %v1620_v58 = vrot.slane %v2741_v50, %v2700_v25 }
  0x91   : > { %2008 = vmatpush3.bf16.msra.mxu0 %v2156_v10  ;;  %2033 = vmatprep.subr.bf16.mxu1 %v2392_v0 }
  0x92   : > { %2009 = vmatprep.subr.bf16.mxu0 %v2158_v13  ;;  %884 = vbcast.lane.b32.xlu1 %v882_v32, 256 }
  0x94   : > { %2034 = vmatpush3.bf16.msra.mxu1 %v2159_v17  ;;  %891 = vbcast.lane.b32.xlu0 %v889_v38, 256 }
  0x95   : > { %2010 = vmatpush3.bf16.msra.mxu0 %v2158_v13  ;;  %2035 = vmatprep.subr.bf16.mxu1 %v2392_v0 }
  0x96   : > { %2011 = vmatprep.subr.bf16.mxu0 %v2160_v18  ;;  %898 = vbcast.lane.b32.xlu1 %v896_v39, 256 }
  0x98   : > { %2036 = vmatpush3.bf16.msra.mxu1 %v2161_v22  ;;  %1601 = vbcast.lane.b32.xlu0 %v1599_v54, 256 }
  0x99   : > { %2012 = vmatpush3.bf16.msra.mxu0 %v2160_v18  ;;  %2037 = vmatprep.subr.bf16.mxu1 %v2392_v0 }
  0x9a   : > { %2013 = vmatprep.subr.bf16.mxu0 %v2162_v26  ;;  %1594 = vbcast.lane.b32.xlu1 %v1592_v53, 256 }
  0x9c   : > { %2038 = vmatpush3.bf16.msra.mxu1 %v2163_v28  ;;  %1608 = vbcast.lane.b32.xlu0 %v1606_v56, 256 }
  0x9d   : > { %2014 = vmatpush3.bf16.msra.mxu0 %v2162_v26 }
  0x9e   : > { %2043 = vmatprep.subr.bf16.mxu0 %v2392_v0  ;;  %1615 = vbcast.lane.b32.xlu1 %v1613_v55, 256 }
  0x9f   : > { %2040 = vmatmul.mubr.bf16.vlgmr.msra.gmra.mxu1 %v2165_v35 }
  0xa0   : > { %2016 = vmatmul.mubr.bf16.vlgmr.msra.gmra.mxu0 %v2166_v36  ;;  %1622 = vbcast.lane.b32.xlu0 %v1620_v58, 256 }
  0xa1   : > { %2019 = vmatprep.mubr.bf16.mxu0 %v2167_v37  ;;  %2044 = vmatpush3.bf16.msra.mxu0 %v2169_v41 }
  0xa2   : > { %2045 = vmatprep.subr.bf16.mxu0 %v2392_v0  ;;  %1636 = vbcast.lane.b32.xlu1 %v1634_v57, 256 }
  0xa5   : > { %2046 = vmatpush3.bf16.msra.mxu0 %v2170_v42 }
  0xa6   : > { %2047 = vmatprep.subr.bf16.mxu0 %v2392_v0 }
  0xa8   : > { %2020 = vmatmul.mubr.bf16.gmra.mxu0 %v2168_v40 }
  0xa9   : > { %2059 = vmatprep.mubr.msk.bf16.mxu0 %vm2393_vm0, %v2392_v0  ;;  %2048 = vmatpush3.bf16.msra.mxu0 %v2171_v43 }
  0xaa   : > { %2049 = vmatprep.subr.bf16.mxu0 %v2392_v0 }
  0xad   : > { %2050 = vmatpush3.bf16.msra.mxu0 %v2172_v44 }
  0xae   : > { %2051 = vmatprep.subr.bf16.mxu0 %v2392_v0 }
  0xb1   : > { %2052 = vmatpush3.bf16.msra.mxu0 %v2173_v47 }
  0xb2   : > { %2053 = vmatprep.subr.bf16.mxu0 %v2392_v0 }
  0xb5   : > { %2054 = vmatpush3.bf16.msra.mxu0 %v2174_v49 }
  0xb6   : > { %2055 = vmatprep.subr.bf16.mxu0 %v2392_v0 }
  0xb9   : > { %2056 = vmatpush3.bf16.msra.mxu0 %v2175_v51 }
  0xba   : > { %2057 = vmatprep.subr.bf16.mxu0 %v2392_v0 }
  0xbd   : > { %2058 = vmatpush3.bf16.msra.mxu0 %v2176_v52 }
  0xfa   : > { %v850_v28 = vpop.permute.xlu0 %849 }
  0xfc   : > { %v864_v53 = vpop.permute.xlu1 %863 }
  0xfe   : > { %v857_v59 = vpop.permute.xlu0 %856 }
 0x15f   : > { %v827_v0 = vpop.f32.mrf.mxu1 }
 0x160   : > { %v2017_v1 = vpop.f32.mrf.mxu0  ;;  %v841_v2 = vadd.f32 %v1955_v62, %v827_v0 }
 0x161   : > { %v2041_v3 = vpop.f32.mrf.mxu1 }
 0x162   : > { %v690_v4 = vpop.f32.mrf.mxu0  ;;  %v901_v5 = vcombine.high %v841_v2, %v841_v2  ;;  %v908_v6 = vrot.slane %v841_v2, %v2760_v63 }
 0x163   : > { %v830_v7 = vpop.f32.mrf.mxu1 }
 0x164   : > { %v916_v9 = vcombine.high %v908_v6, %v908_v6  ;;  %v924_v10 = vrot.slane %v908_v6, %v2760_v63  ;;  %v842_v11 = vadd.f32 %v1955_v62, %v830_v7  ;;  %v2018_v13 = vpop.f32.mrf.mxu0  ;;  %v2765_v17 = vrot.slane %v901_v5, %v2760_v63 }
 0x165   : > { %v2042_v14 = vpop.f32.mrf.mxu1 }
 0x166   : > { %v938_v18 = vrot.slane %v916_v9, %v2760_v63  ;;  %v946_v19 = vcombine.high %v924_v10, %v924_v10  ;;  %v953_v22 = vrot.slane %v924_v10, %v2685_v15  ;;  %v1063_v23 = vcombine.high %v842_v11, %v842_v11  ;;  %v693_v36 = vpop.f32.mrf.mxu0 }
 0x167   : > { %v1070_v24 = vrot.slane %v842_v11, %v2760_v63  ;;  %v2775_v37 = vrot.slane %v2765_v17, %v2760_v63  ;;  %v917_v41 = vcombine.high %v2765_v17, %v2765_v17 }
 0x168   : > { %v961_v26 = vrot.slane %v946_v19, %v2685_v15  ;;  %v948_v29 = vcombine.high %v938_v18, %v938_v18  ;;  %v957_v30 = vrot.slane %v938_v18, %v2685_v15  ;;  %v990_v31 = vadd.f32 %v953_v22, %v690_v4 }
 0x169   : > { %v1078_v32 = vcombine.high %v1070_v24, %v1070_v24  ;;  %v1086_v35 = vrot.slane %v1070_v24, %v2760_v63  ;;  %v2781_v43 = vrot.slane %v1063_v23, %v2760_v63  ;;  %v947_v60 = vcombine.high %v2775_v37, %v2775_v37 }
 0x16a   : > { %v992_v38 = vadd.f32 %v2017_v1, %v961_v26  ;;  %v965_v39 = vrot.slane %v948_v29, %v2685_v15  ;;  %v991_v40 = vadd.f32 %v957_v30, %v693_v36  ;;  %v998_v42 = vmax.f32 %v990_v31, 0.0 }
 0x16b   : > { %v1100_v44 = vrot.slane %v1078_v32, %v2760_v63  ;;  %v1108_v47 = vcombine.high %v1086_v35, %v1086_v35  ;;  %v1115_v48 = vrot.slane %v1086_v35, %v2685_v15  ;;  %v2792_v3 = vrot.slane %v2781_v43, %v2760_v63  ;;  %v871_v35 = vpop.permute.xlu1 %870 }
 0x16c   : > { %v1000_v45 = vmax.f32 %v992_v38, 0.0  ;;  %v993_v49 = vadd.f32 %v2018_v13, %v965_v39  ;;  %v1006_v51 = vmul.f32 %v998_v42, %v850_v28  ;;  %v999_v54 = vmax.f32 %v991_v40, 0.0 }
 0x16d   : > { %v1110_v52 = vcombine.high %v1100_v44, %v1100_v44  ;;  %v1119_v55 = vrot.slane %v1100_v44, %v2685_v15  ;;  %v1152_v56 = vadd.f32 %v1115_v48, %v690_v4  ;;  %v1123_v58 = vrot.slane %v1108_v47, %v2685_v15 }
 0x16e   : > { %v1008_v57 = vmul.f32 %v1000_v45, %v864_v53  ;;  %v1014_v61 = vrot.slane %v1006_v51, 4  ;;  %v1007_v2 = vmul.f32 %v999_v54, %v857_v59  ;;  %v1001_v9 = vmax.f32 %v993_v49, 0.0  ;;  %v2021_v45 = vpop.f32.mrf.mxu0 }
 0x16f   : > { %v1127_v62 = vrot.slane %v1110_v52, %v2685_v15  ;;  %v1153_v0 = vadd.f32 %v1119_v55, %v693_v36  ;;  %v1160_v5 = vmax.f32 %v1152_v56, 0.0  ;;  %v1154_v7 = vadd.f32 %v2017_v1, %v1123_v58 }
 0x170   : > { %v1026_v6 = vrot.slane %v1008_v57, 4  ;;  %v1015_v4 = vadd.f32 %v1014_v61, %v1006_v51  ;;  %v1020_v11 = vrot.slane %v1007_v2, 4  ;;  %v977_v22 = vrot.slane %v947_v60, %v2685_v15 }
 0x171   : > { %v1161_v10 = vmax.f32 %v1153_v0, 0.0  ;;  %v1168_v14 = vmul.f32 %v1160_v5, %v850_v28  ;;  %v1162_v19 = vmax.f32 %v1154_v7, 0.0  ;;  %v1155_v24 = vadd.f32 %v2018_v13, %v1127_v62 }
 0x172   : > { %v1027_v18 = vadd.f32 %v1026_v6, %v1008_v57  ;;  %v1016_v23 = vrot.slane %v1015_v4, 2  ;;  %v1021_v26 = vadd.f32 %v1020_v11, %v1007_v2  ;;  %v1109_v1 = vcombine.high %v2792_v3, %v2792_v3  ;;  %v706_v2 = vpop.f32.mrf.mxu0 }
 0x173   : > { %v1169_v29 = vmul.f32 %v1161_v10, %v857_v59  ;;  %v1176_v30 = vrot.slane %v1168_v14, 4  ;;  %v1170_v32 = vmul.f32 %v1162_v19, %v864_v53  ;;  %v1009_v28 = vmul.f32 %v1001_v9, %v871_v35 }
 0x174   : > { %v1028_v31 = vrot.slane %v1027_v18, 2  ;;  %v1017_v36 = vadd.f32 %v1016_v23, %v1015_v4  ;;  %v1022_v38 = vrot.slane %v1021_v26, 2  ;;  %v1139_v13 = vrot.slane %v1109_v1, %v2685_v15 }
 0x175   : > { %v1182_v39 = vrot.slane %v1169_v29, 4  ;;  %v1177_v40 = vadd.f32 %v1176_v30, %v1168_v14  ;;  %v1188_v44 = vrot.slane %v1170_v32, 4  ;;  %v1163_v47 = vmax.f32 %v1155_v24, 0.0  ;;  %v878_v14 = vpop.permute.xlu0 %877 }
 0x176   : > { %v1029_v42 = vadd.f32 %v1028_v31, %v1027_v18  ;;  %v1023_v48 = vadd.f32 %v1022_v38, %v1021_v26  ;;  %v1032_v51 = vrot.slane %v1009_v28, 4  ;;  %v1018_v52 = vrot.slane %v1017_v36, 1  ;;  %v2022_v31 = vpop.f32.mrf.mxu0 }
 0x177   : > { %v1183_v49 = vadd.f32 %v1182_v39, %v1169_v29  ;;  %v1079_v53 = vcombine.high %v2781_v43, %v2781_v43  ;;  %v1178_v54 = vrot.slane %v1177_v40, 2  ;;  %v1189_v55 = vadd.f32 %v1188_v44, %v1170_v32 }
 0x178   : > { %v1030_v56 = vrot.slane %v1029_v42, 1  ;;  %v1024_v57 = vrot.slane %v1023_v48, 1  ;;  %v1033_v59 = vadd.f32 %v1032_v51, %v1009_v28  ;;  %v996_v62 = vadd.f32 %v2021_v45, %v977_v22  ;;  %v709_v51 = vpop.f32.mrf.mxu0 }
 0x179   : > { %v1184_v58 = vrot.slane %v1183_v49, 2  ;;  %v1179_v60 = vadd.f32 %v1178_v54, %v1177_v40  ;;  %v1190_v61 = vrot.slane %v1189_v55, 2  ;;  %v2800_v0 = vadd.f32 %v2021_v45, %v1139_v13  ;;  %v885_v45 = vpop.permute.xlu1 %884 }
 0x17a   : > { %v1025_v5 = vadd.f32 %v1024_v57, %v1023_v48  ;;  %v1034_v7 = vrot.slane %v1033_v59, 2  ;;  %v1171_v4 = vmul.f32 %v1163_v47, %v871_v35  ;;  %v1019_v9 = vadd.f32 %v1018_v52, %v1017_v36  ;;  %v892_v52 = vpop.permute.xlu0 %891 }
 0x17b   : > { %v1185_v6 = vadd.f32 %v1184_v58, %v1183_v49  ;;  %v1191_v10 = vadd.f32 %v1190_v61, %v1189_v55  ;;  %v969_v43 = vrot.slane %v2775_v37, %v2685_v15  ;;  %v1131_v11 = vrot.slane %v2792_v3, %v2685_v15 }
 0x17c   : > { %v1180_v18 = vrot.slane %v1179_v60, 1  ;;  %v1031_v19 = vadd.f32 %v1030_v56, %v1029_v42  ;;  %v1194_v22 = vrot.slane %v1171_v4, 4  ;;  %v1233_v24 = vsel %vm1232_vm1, %v1025_v5, %v1019_v9 }
 0x17d   : > { %v1186_v23 = vrot.slane %v1185_v6, 1  ;;  %v1004_v26 = vmax.f32 %v996_v62, 0.0  ;;  %v1035_v29 = vadd.f32 %v1034_v7, %v1033_v59  ;;  %v994_v30 = vadd.f32 %v969_v43, %v706_v2  ;;  %v899_v43 = vpop.permute.xlu1 %898 }
 0x17e   : > { %v1192_v32 = vrot.slane %v1191_v10, 1  ;;  %v1195_v35 = vadd.f32 %v1194_v22, %v1171_v4  ;;  %v1156_v36 = vadd.f32 %v1131_v11, %v706_v2  ;;  %v1166_v37 = vmax.f32 %v2800_v0, 0.0 }
 0x17f   : > { %v1187_v1 = vadd.f32 %v1186_v23, %v1185_v6  ;;  %v1002_v38 = vmax.f32 %v994_v30, 0.0  ;;  %v945_v3 = vrot.slane %v917_v41, %v2760_v63  ;;  %v1107_v39 = vrot.slane %v1079_v53, %v2760_v63 }
 0x180   : > { %v1181_v28 = vadd.f32 %v1180_v18, %v1179_v60  ;;  %v1196_v40 = vrot.slane %v1195_v35, 2  ;;  %v2814_v42 = vsel %vm1234_vm2, %v1031_v19, %v1233_v24  ;;  %v1164_v44 = vmax.f32 %v1156_v36, 0.0 }
 0x181   : > { %v1036_v13 = vrot.slane %v1035_v29, 1  ;;  %v1010_v47 = vmul.f32 %v1002_v38, %v878_v14  ;;  %v949_v48 = vcombine.high %v945_v3, %v945_v3  ;;  %v1111_v49 = vcombine.high %v1107_v39, %v1107_v39 }
 0x182   : > { %v1193_v54 = vadd.f32 %v1192_v32, %v1191_v10  ;;  %v1255_v55 = vsel %vm1232_vm1, %v1187_v1, %v1181_v28  ;;  %v1172_v17 = vmul.f32 %v1164_v44, %v878_v14  ;;  %v973_v41 = vrot.slane %v945_v3, %v2685_v15 }
 0x183   : > { %v1038_v53 = vrot.slane %v1010_v47, 4  ;;  %v981_v56 = vrot.slane %v949_v48, %v2685_v15  ;;  %v1143_v57 = vrot.slane %v1111_v49, %v2685_v15  ;;  %v1135_v58 = vrot.slane %v1107_v39, %v2685_v15 }
 0x184   : > { %v1197_v59 = vadd.f32 %v1196_v40, %v1195_v35  ;;  %v1200_v60 = vrot.slane %v1172_v17, 4  ;;  %v995_v61 = vadd.f32 %v973_v41, %v709_v51  ;;  %v1012_v62 = vmul.f32 %v1004_v26, %v892_v52 }
 0x185   : > { %v1039_v0 = vadd.f32 %v1038_v53, %v1010_v47  ;;  %v997_v2 = vadd.f32 %v2022_v31, %v981_v56  ;;  %v1159_v5 = vadd.f32 %v2022_v31, %v1143_v57  ;;  %v1157_v6 = vadd.f32 %v1135_v58, %v709_v51 }
 0x186   : > { %v1037_v7 = vadd.f32 %v1036_v13, %v1035_v29  ;;  %v1201_v4 = vadd.f32 %v1200_v60, %v1172_v17  ;;  %v1003_v9 = vmax.f32 %v995_v61, 0.0  ;;  %v1050_v10 = vrot.slane %v1012_v62, 4 }
 0x187   : > { %v1040_v11 = vrot.slane %v1039_v0, 2  ;;  %v1005_v14 = vmax.f32 %v997_v2, 0.0  ;;  %v1167_v18 = vmax.f32 %v1159_v5, 0.0  ;;  %v1165_v19 = vmax.f32 %v1157_v6, 0.0 }
 0x188   : > { %v1198_v23 = vrot.slane %v1197_v59, 1  ;;  %v1202_v22 = vrot.slane %v1201_v4, 2  ;;  %v1011_v24 = vmul.f32 %v1003_v9, %v885_v45  ;;  %v1051_v30 = vadd.f32 %v1050_v10, %v1012_v62 }
 0x189   : > { %v1041_v32 = vadd.f32 %v1040_v11, %v1039_v0  ;;  %v1173_v1 = vmul.f32 %v1165_v19, %v885_v45  ;;  %v1174_v26 = vmul.f32 %v1166_v37, %v892_v52  ;;  %v1013_v35 = vmul.f32 %v1005_v14, %v899_v43 }
 0x18a   : > { %v1203_v36 = vadd.f32 %v1202_v22, %v1201_v4  ;;  %v1044_v31 = vrot.slane %v1011_v24, 4  ;;  %v1052_v38 = vrot.slane %v1051_v30, 2  ;;  %v1175_v29 = vmul.f32 %v1167_v18, %v899_v43 }
 0x18b   : > { %v1256_v3 = vsel %vm1234_vm2, %v1193_v54, %v1255_v55  ;;  %v1206_v39 = vrot.slane %v1173_v1, 4  ;;  %v1212_v28 = vrot.slane %v1174_v26, 4  ;;  %v1056_v40 = vrot.slane %v1013_v35, 4 }
 0x18c   : > { %v1199_v44 = vadd.f32 %v1198_v23, %v1197_v59  ;;  %v1042_v13 = vrot.slane %v1041_v32, 1  ;;  %v1045_v47 = vadd.f32 %v1044_v31, %v1011_v24  ;;  %v1218_v48 = vrot.slane %v1175_v29, 4 }
 0x18d   : > { %v1207_v49 = vadd.f32 %v1206_v39, %v1173_v1  ;;  %v1053_v51 = vadd.f32 %v1052_v38, %v1051_v30  ;;  %v1213_v17 = vadd.f32 %v1212_v28, %v1174_v26  ;;  %v1057_v41 = vadd.f32 %v1056_v40, %v1013_v35 }
 0x18e   : > { %v1204_v37 = vrot.slane %v1203_v36, 1  ;;  %v1046_v45 = vrot.slane %v1045_v47, 2  ;;  %v1219_v52 = vadd.f32 %v1218_v48, %v1175_v29  ;;  %v1237_v53 = vsel %vm1236_vm3, %v1037_v7, %v2814_v42  ;;  %v1956_v29 = vld [vmem:[%s2945_s7] ss:$0 sm:$0xff] }
 0x18f   : > { %v1208_v56 = vrot.slane %v1207_v49, 2  ;;  %v1214_v54 = vrot.slane %v1213_v17, 2  ;;  %v1058_v55 = vrot.slane %v1057_v41, 2  ;;  %v1257_v57 = vsel %vm1236_vm3, %v1199_v44, %v1256_v3 }
 0x190   : > { %v1043_v58 = vadd.f32 %v1042_v13, %v1041_v32  ;;  %v1047_v59 = vadd.f32 %v1046_v45, %v1045_v47  ;;  %v1220_v60 = vrot.slane %v1219_v52, 2  ;;  %v1054_v62 = vrot.slane %v1053_v51, 1 }
 0x191   : > { %v1209_v61 = vadd.f32 %v1208_v56, %v1207_v49  ;;  %v1215_v0 = vadd.f32 %v1214_v54, %v1213_v17  ;;  %v1059_v2 = vadd.f32 %v1058_v55, %v1057_v41  ;;  %v1205_v5 = vadd.f32 %v1204_v37, %v1203_v36  ;;  %v1399_v54 = vld [vmem:[%s2653_s28 + $0x10] sm:$0xff] }
 0x192   : > { %v1048_v6 = vrot.slane %v1047_v59, 1  ;;  %v1221_v4 = vadd.f32 %v1220_v60, %v1219_v52  ;;  %v1239_v9 = vsel %vm1238_vm4, %v1043_v58, %v1237_v53  ;;  %v1055_v19 = vadd.f32 %v1054_v62, %v1053_v51  ;;  %v1402_v58 = vld [vmem:[%s2653_s28 + $0x28] sm:$0xff] }
 0x193   : > { %v1210_v10 = vrot.slane %v1209_v61, 1  ;;  %v1216_v42 = vrot.slane %v1215_v0, 1  ;;  %v1060_v7 = vrot.slane %v1059_v2, 1  ;;  %v1258_v43 = vsel %vm1238_vm4, %v1205_v5, %v1257_v57 }
 0x194   : > { %v1049_v11 = vadd.f32 %v1048_v6, %v1047_v59  ;;  %v1222_v14 = vrot.slane %v1221_v4, 1  ;;  %v2834_v38 = vand.u32 127, %v844_v8  ;;  %v1627_v62 = vrot.slane %v2741_v50, %v2704_v27 }
 0x195   : > { %v1211_v18 = vadd.f32 %v1210_v10, %v1209_v61  ;;  %v1217_v23 = vadd.f32 %v1216_v42, %v1215_v0  ;;  %v1061_v32 = vadd.f32 %v1060_v7, %v1059_v2  ;;  %v1641_v5 = vrot.slane %v2741_v50, %v2715_v34  ;;  %v1397_v10 = vld [vmem:[%s2653_s28] sm:$0xff] }
 0x196   : > { %v1241_v22 = vsel %vm1240_vm5, %v1049_v11, %v1239_v9  ;;  %v1223_v1 = vadd.f32 %v1222_v14, %v1221_v4  ;;  %vm1378_vm8 = vcmp.eq.s32.totalorder %v2834_v38, 32  ;;  %v1398_v11 = vld [vmem:[%s2653_s28 + $0x8] sm:$0xff] }
 0x197   : > { %v1243_v24 = vsel %vm1242_vm6, %v1055_v19, %v1241_v22  ;;  %v1259_v30 = vsel %vm1240_vm5, %v1211_v18, %v1258_v43 }
 0x198   : > { %v1260_v26 = vsel %vm1242_vm6, %v1217_v23, %v1259_v30  ;;  %v1245_v35 = vsel %vm1244_vm7, %v1061_v32, %v1243_v24  ;;  %v1401_v23 = vld [vmem:[%s2653_s28 + $0x20] sm:$0xff] }
 0x199   : > { %v1261_v36 = vsel %vm1244_vm7, %v1223_v1, %v1260_v26  ;;  %v1400_v1 = vld [vmem:[%s2653_s28 + $0x18] sm:$0xff] }
 0x19a   : > { %v1263_v31 = vpack.c.bf16 %v1261_v36, %v1245_v35 }
 0x19c   : > { %2060 = vmatmul.mubr.bf16.vlgmr.msra.gmra.mxu0 %v1263_v31  ;;  %v1403_v31 = vld [vmem:[%s2653_s28 + $0x30] sm:$0xff] }
 0x25c   : > { %v1369_v3 = vpop.f32.mrf.mxu0 }
 0x25d   : > { %v1370_v39 = vadd.f32 %v1956_v29, %v1369_v3 }
 0x25e   : > { %v2061_v28 = vpop.f32.mrf.mxu0 }
 0x25f   : > { %v1385_v40 = vsel %vm1378_vm8, %v1370_v39, 0.0  ;;  %v1381_v48 = vsel %vm1378_vm8, 0.0, %v1370_v39  ;;  %v1404_v28 = vld [vmem:[%s2653_s28 + $0x38] sm:$0xff]  ;;  %s2946_s28 = sld [smem:[#allocation19_spill]] }
 0x260   : > { %1387 = vadd.xlane.f32.xlu0 %v1385_v40  ;;  %v1372_v44 = vpop.f32.mrf.mxu0  ;;  %v2395_v40 = vmov 0  }
 0x261   : > { %v1373_v13 = vadd.f32 %v1956_v29, %v1372_v44  ;;  %2146 = vset.pattern.permute.xlu0 %v2395_v40  ;;  %2147 = vset.pattern.permute.xlu1 %v2395_v40 }
 0x262   : > { %v2062_v47 = vpop.f32.mrf.mxu0 }
 0x263   : > { %v1382_v49 = vsel %vm1378_vm8, 0.0, %v1373_v13  ;;  %v1386_v8 = vsel %vm1378_vm8, %v1373_v13, 0.0 }
 0x264   : > { %v1383_v51 = vadd.f32 %v1382_v49, %v1381_v48  ;;  %1389 = vadd.xlane.f32.xlu1 %v1386_v8  ;;  %v1595_v48 = vpop.permute.xlu1 %1594  ;;  %v1602_v49 = vpop.permute.xlu0 %1601 }
 0x265   : > { %s554_s15 = scalar_lea.vmem %s2946_s28, %s2676_s20 }
 0x266   : > { %v1384_v17 = vmul.f32 0.5, %v1383_v51 }
 0x268   : > { %v1408_v41 = vcombine.high %v1384_v17, %v1384_v17  ;;  %v1415_v37 = vrot.slane %v1384_v17, %v2760_v63  ;;  %v1616_v8 = vpop.permute.xlu1 %1615  ;;  %v1609_v51 = vpop.permute.xlu0 %1608 }
 0x26a   : > { %v1422_v45 = vrot.slane %v1408_v41, %v2760_v63  ;;  %v1431_v52 = vrot.slane %v1415_v37, %v2760_v63  ;;  %v1423_v6 = vcombine.high %v1415_v37, %v1415_v37 }
 0x26c   : > { %v1453_v53 = vcombine.high %v1431_v52, %v1431_v52  ;;  %v1424_v56 = vcombine.high %v1422_v45, %v1422_v45  ;;  %v1460_v4 = vrot.slane %v1431_v52, %v2685_v15  ;;  %v1445_v9 = vrot.slane %v1423_v6, %v2760_v63  ;;  %v1637_v17 = vpop.permute.xlu1 %1636  ;;  %v1623_v41 = vpop.permute.xlu0 %1622 }
 0x26d   : > { %v1438_v43 = vrot.slane %v1422_v45, %v2760_v63 }
 0x26e   : > { %v1468_v55 = vrot.slane %v1453_v53, %v2685_v15  ;;  %v1452_v57 = vrot.slane %v1424_v56, %v2760_v63  ;;  %v1497_v42 = vsub.f32 %v1460_v4, %v1397_v10  ;;  %v1464_v7 = vrot.slane %v1445_v9, %v2685_v15 }
 0x26f   : > { %v1476_v19 = vrot.slane %v1438_v43, %v2685_v15  ;;  %v1455_v50 = vcombine.high %v1445_v9, %v1445_v9  ;;  %v1454_v32 = vcombine.high %v1438_v43, %v1438_v43 }
 0x270   : > { %v1499_v59 = vsub.f32 %v1468_v55, %v1399_v54  ;;  %v1480_v60 = vrot.slane %v1452_v57, %v2685_v15  ;;  %v1505_v14 = vmul.f32 %v1497_v42, %v1497_v42  ;;  %v1498_v18 = vsub.f32 %v1464_v7, %v1398_v11 }
 0x271   : > { %v1501_v24 = vsub.f32 %v1476_v19, %v1401_v23  ;;  %v1472_v30 = vrot.slane %v1455_v50, %v2685_v15  ;;  %v1484_v63 = vrot.slane %v1454_v32, %v2685_v15  ;;  %v1456_v36 = vcombine.high %v1452_v57, %v1452_v57 }
 0x272   : > { %v1507_v61 = vmul.f32 %v1499_v59, %v1499_v59  ;;  %v1502_v0 = vsub.f32 %v1480_v60, %v1402_v58  ;;  %v1506_v22 = vmul.f32 %v1498_v18, %v1498_v18 }
 0x273   : > { %v1509_v26 = vmul.f32 %v1501_v24, %v1501_v24  ;;  %v1500_v35 = vsub.f32 %v1472_v30, %v1400_v1  ;;  %v1503_v3 = vsub.f32 %v1484_v63, %v1403_v31  ;;  %v1488_v39 = vrot.slane %v1456_v36, %v2685_v15 }
 0x274   : > { %1517 = vadd.xlane.f32.xlu1 %v1507_v61  ;;  %v1510_v2 = vmul.f32 %v1502_v0, %v1502_v0 }
 0x275   : > { %v1508_v29 = vmul.f32 %v1500_v35, %v1500_v35  ;;  %v1511_v44 = vmul.f32 %v1503_v3, %v1503_v3  ;;  %v1504_v13 = vsub.f32 %v1488_v39, %v1404_v28 }
 0x276   : > { %1629 = vbcast.lane.b32.xlu0 %v1627_v62, 256 }
 0x277   : > { %v1512_v47 = vmul.f32 %v1504_v13, %v1504_v13 }
 0x278   : > { %1523 = vadd.xlane.f32.xlu1 %v1510_v2 }
 0x289   : > { %1643 = vbcast.lane.b32.xlu1 %v1641_v5, 256 }
 0x295   : > { %1513 = vadd.xlane.f32.xlu0 %v1505_v14 }
 0x299   : > { %1515 = vadd.xlane.f32.xlu0 %v1506_v22 }
 0x29d   : > { %1521 = vadd.xlane.f32.xlu0 %v1509_v26 }
 0x2a1   : > { %1519 = vadd.xlane.f32.xlu0 %v1508_v29 }
 0x2a5   : > { %1525 = vadd.xlane.f32.xlu0 %v1511_v44 }
 0x2a9   : > { %1527 = vadd.xlane.f32.xlu0 %v1512_v47 }
 0x2e9   : > { %v1388_v45 = vpop.xlane.xlu0 %1387 }
 0x2ea   : > { %v1391_v53 = vmul.f32 1.442695, %v1388_v45 }
 0x2ed   : > { %v1390_v37 = vpop.xlane.xlu1 %1389  ;;  %v1630_v60 = vpop.permute.xlu0 %1629 }
 0x2ee   : > { %v1393_v52 = vmul.f32 1.442695, %v1390_v37 }
 0x2f0   : > { %2177 = vpow2.f32 %v1393_v52 }
 0x2f1   : > { %2179 = vpow2.f32 %v1391_v53 }
 0x2f2   : > { %2181 = vrcp.f32 %v1595_v48 }
 0x2f3   : > { %2183 = vrcp.f32 %v1602_v49 }
 0x2f4   : > { %2185 = vrcp.f32 %v1609_v51 }
 0x2f5   : > { %2187 = vrcp.f32 %v1616_v8 }
 0x2f6   : > { %2189 = vrcp.f32 %v1623_v41 }
 0x2f7   : > { %2191 = vrcp.f32 %v1630_v60 }
 0x2f8   : > { %2193 = vrcp.f32 %v1637_v17 }
 0x2fd   : > { %v2178_v56 = vpop.eup %2177  ;;  %v1518_v5 = vpop.xlane.xlu1 %1517 }
 0x2fe   : > { %v2180_v54 = vpop.eup %2179 }
 0x2ff   : > { %v1395_v55 = vadd.f32 %v2180_v54, %v2178_v56  ;;  %v2182_v2 = vpop.eup %2181 }
 0x300   : > { %v2184_v7 = vpop.eup %2183 }
 0x301   : > { %v1396_v57 = vmul.f32 0.5, %v1395_v55  ;;  %v1524_v14 = vpop.xlane.xlu1 %1523 }
 0x303   : > { %v1535_v58 = vmul.f32 32.0, %v1396_v57 }
 0x305   : > { %v1536_v59 = vmul.f32 %v1535_v58, %v1396_v57  ;;  %v1644_v23 = vpop.permute.xlu1 %1643 }
 0x306   : > { %2195 = vrcp.f32 %v1644_v23 }
 0x307   : > { %v1541_v61 = vrot.slane %v1536_v59, %v2685_v15  ;;  %v1549_v6 = vrot.slane %v1536_v59, %v2688_v16  ;;  %v1545_v9 = vrot.slane %v1536_v59, %v2692_v20  ;;  %v2186_v15 = vpop.eup %2185  ;;  %v1553_v50 = vrot.slane %v1536_v59, %v2695_v21 }
 0x308   : > { %v1557_v20 = vrot.slane %v1536_v59, %v2700_v25  ;;  %v2188_v24 = vpop.eup %2187  ;;  %v1561_v30 = vrot.slane %v1536_v59, %v2704_v27  ;;  %v1565_v21 = vrot.slane %v1536_v59, %v2712_v33  ;;  %v1569_v39 = vrot.slane %v1536_v59, %v2715_v34 }
 0x309   : > { %v1580_v43 = vadd.f32 %v1549_v6, %v1518_v5  ;;  %v2190_v26 = vpop.eup %2189  ;;  %2197 = vlog2.f32 %v2735_v46  ;;  %v1703_v34 = vsub.s32 %v2834_v38, %v2674_v12 }
 0x30a   : > { %v1583_v63 = vadd.f32 %v1561_v30, %v1524_v14  ;;  %v2192_v31 = vpop.eup %2191  ;;  %2199 = vlog2.f32 %v1396_v57 }
 0x30b   : > { %v1658_v19 = vmul.f32 %v2186_v15, %v1580_v43  ;;  %v2194_v28 = vpop.eup %2193 }
 0x30c   : > { %v1664_v29 = vmul.f32 %v2192_v31, %v1583_v63 }
 0x313   : > { %v2196_v44 = vpop.eup %2195 }
 0x316   : > { %v2198_v8 = vpop.eup %2197 }
 0x317   : > { %v2200_v51 = vpop.eup %2199  ;;  %v1530_v52 = vmul.f32 0.6931472, %v2198_v8 }
 0x318   : > { %v1532_v53 = vmul.f32 0.6931472, %v2200_v51 }
 0x31e   : > { %v1514_v62 = vpop.xlane.xlu0 %1513 }
 0x31f   : > { %v1578_v0 = vadd.f32 %v1541_v61, %v1514_v62  ;;  %v1533_v61 = vsub.f32 %v1530_v52, %v1532_v53 }
 0x321   : > { %v1654_v4 = vmul.f32 %v2182_v2, %v1578_v0  ;;  %v1534_v6 = vmul.f32 32.0, %v1533_v61 }
 0x322   : > { %v1516_v10 = vpop.xlane.xlu0 %1515 }
 0x323   : > { %v1579_v42 = vadd.f32 %v1545_v9, %v1516_v10  ;;  %1678 = vperm.xlu0 %2146, %v1654_v4   ;;  %v1743_v9 = vld [vmem:[%s554_s15] sm:$0xff] }
 0x324   : > { %vm1744_vm9 = vcmp.gt.f32.partialorder %v1743_v9, 0.0 }
 0x325   : > { %v1656_v11 = vmul.f32 %v2184_v7, %v1579_v42 }
 0x326   : > { %v1522_v18 = vpop.xlane.xlu0 %1521 }
 0x327   : > { %1681 = vperm.xlu1 %2147, %v1656_v11   ;;  %v1582_v32 = vadd.f32 %v1557_v20, %v1522_v18 }
 0x329   : > { %v1662_v36 = vmul.f32 %v2190_v26, %v1582_v32 }
 0x32a   : > { %v1520_v16 = vpop.xlane.xlu0 %1519 }
 0x32b   : > { %v1581_v22 = vadd.f32 %v1553_v50, %v1520_v16  ;;  %1684 = vperm.xlu1 %2147, %v1658_v19  }
 0x32d   : > { %v1660_v1 = vmul.f32 %v2188_v24, %v1581_v22 }
 0x32e   : > { %v1526_v35 = vpop.xlane.xlu0 %1525 }
 0x32f   : > { %1687 = vperm.xlu1 %2147, %v1660_v1   ;;  %v1584_v3 = vadd.f32 %v1565_v21, %v1526_v35 }
 0x331   : > { %v1666_v27 = vmul.f32 %v2194_v28, %v1584_v3 }
 0x332   : > { %v1528_v25 = vpop.xlane.xlu0 %1527 }
 0x333   : > { %1690 = vperm.xlu1 %2147, %v1662_v36   ;;  %v1585_v40 = vadd.f32 %v1569_v39, %v1528_v25 }
 0x335   : > { %v1668_v13 = vmul.f32 %v2196_v44, %v1585_v40 }
 0x337   : > { %1693 = vperm.xlu1 %2147, %v1664_v29  }
 0x33b   : > { %1696 = vperm.xlu1 %2147, %v1666_v27  }
 0x33f   : > { %1699 = vperm.xlu1 %2147, %v1668_v13  }
 0x39e   : > { %v1679_v17 = vpop.permute.xlu0 %1678 }
 0x39f   : > { %v1704_v56 = vrot.slane %v1679_v17, %v1703_v34 }
 0x3a2   : > { %v1682_v47 = vpop.permute.xlu1 %1681 }
 0x3a3   : > { %v1708_v37 = vrot.slane %v1682_v47, %v1703_v34 }
 0x3a5   : > { %v1733_v57 = vsel %vm1232_vm1, %v1708_v37, %v1704_v56 }
 0x3a6   : > { %v1685_v33 = vpop.permute.xlu1 %1684 }
 0x3a7   : > { %v1712_v45 = vrot.slane %v1685_v33, %v1703_v34 }
 0x3a9   : > { %v1734_v59 = vsel %vm1234_vm2, %v1712_v45, %v1733_v57 }
 0x3aa   : > { %v1688_v48 = vpop.permute.xlu1 %1687 }
 0x3ab   : > { %v1716_v54 = vrot.slane %v1688_v48, %v1703_v34 }
 0x3ad   : > { %v1735_v12 = vsel %vm1236_vm3, %v1716_v54, %v1734_v59 }
 0x3ae   : > { %v1691_v49 = vpop.permute.xlu1 %1690 }
 0x3af   : > { %v1720_v55 = vrot.slane %v1691_v49, %v1703_v34 }
 0x3b1   : > { %v1736_v38 = vsel %vm1238_vm4, %v1720_v55, %v1735_v12 }
 0x3b2   : > { %v1694_v41 = vpop.permute.xlu1 %1693 }
 0x3b3   : > { %v1724_v58 = vrot.slane %v1694_v41, %v1703_v34 }
 0x3b5   : > { %v1737_v0 = vsel %vm1240_vm5, %v1724_v58, %v1736_v38 }
 0x3b6   : > { %v1697_v46 = vpop.permute.xlu1 %1696 }
 0x3b7   : > { %v1728_v60 = vrot.slane %v1697_v46, %v1703_v34 }
 0x3b9   : > { %v1738_v5 = vsel %vm1242_vm6, %v1728_v60, %v1737_v0 }
 0x3ba   : > { %v1700_v62 = vpop.permute.xlu1 %1699 }
 0x3bb   : > { %v1732_v2 = vrot.slane %v1700_v62, %v1703_v34 }
 0x3bd   : > { %v1739_v4 = vsel %vm1244_vm7, %v1732_v2, %v1738_v5 }
 0x3be   : > { %v1741_v10 = vadd.f32 %v1739_v4, %v1534_v6 }
 0x3c0   : > { %v1965_v42 = vadd.f32 -16.0, %v1741_v10 }
 0x3c2   : > { %v1745_v7 = vsub.f32 0.0, %v1965_v42 }
 0x3c4   : > { %v1746_v43 = vsel %vm1744_vm9, -inf, %v1745_v7 }
 0x3c5   : > { %1748 = vst.msk [vmem:[%s558_s12] sm:$0xff] %vm1747_vm10, %v1746_v43 }
 0x3c6 PF: > { %s2948_s20 = sld [smem:[#allocation14_spill]]  ;;  %s2950_s17 = smov %s2373_s18 }
 0x3c7   : > { %s2949_s23 = sld [smem:[#allocation15_spill]]  ;;  %s2951_s18 = smov %s2377_s19 }
 0x3cc   : > { %p23_p9 = scmp.ge.s32.totalorder %s2948_s20, 4  }
 0x3cd   : > { %s2952_s19 = smov %s2949_s23 }
 0x3ce   :  { %25 = sbr.rel (!%p23_p9) target bundleno = 11 (0xb), region = 139 }
 0x3d3   :  { %1768 = vsyncpa [#allocation3], 1 }
 0x3d4   :  { %1770 = vsyncpa [#allocation3 + $0x1], 1 }
 0x3d5   :  { %1771 = vsyncpa [#allocation5], 1 }
 0x3d6   :  { %1772 = vsyncpa [#allocation8], 1 }

</bundles_post_ra>
